<compile_context>
chip_gen: v6e
topology: v6e:2x2x1
jax: 0.10.0
libtpu: 0.0.40
codegen_flags: <defaults>
</compile_context>

<pallas_src>
from functools import partial

import jax
import jax.numpy as jnp
from jax.experimental import pallas as pl
from jax.experimental.pallas import tpu as pltpu


def fused_net_kernel(x1p_ref, w1_ref, b1_ref, w2_ref, b2_ref,
                     wf1_ref, bf1_ref, wf3_ref, bf3_ref, wf4_ref, bf4_ref,
                     out_ref):
    """Whole-network forward for one batch block.

    x1p_ref:  (Bt, 8, 8, 1)   input zero-padded by 1 (NHWC)
    w1_ref:   (3, 3, 64)      conv1 taps, (kh, kw, cout)         b1_ref: (1, 64)
    w2_ref:   (576, 64)       conv2 weight, K ordered (kh,kw,cin) b2_ref: (1, 64)
    wf1_ref:  (576, H1)       fc1 weight, rows ordered (i,j,c)    bf1_ref: (1, H1)
    wf3_ref:  (H1, H3)        bf3_ref: (1, H3)
    wf4_ref:  (H3, OUTP)      fc4 weight, columns zero-padded to OUTP (mult of 128)
    bf4_ref:  (1, OUTP)
    out_ref:  (Bt, OUTP)
    """
    Bt = x1p_ref.shape[0]
    x = x1p_ref[...]                                   # (Bt, 8, 8, 1)
    w1 = w1_ref[...]                                   # (3, 3, 64)

    # ---- conv1 (Cin = 1) + bias + ReLU on the interior 6x6 only ----
    acc1 = jnp.zeros((Bt, 6, 6, 64), jnp.float32)
    for dh in range(3):
        for dw in range(3):
            acc1 = acc1 + x[:, dh:dh + 6, dw:dw + 6, :] * w1[dh:dh + 1, dw:dw + 1, :]
    h1 = jnp.maximum(acc1 + b1_ref[...], 0.0)          # (Bt, 6, 6, 64)

    # Zero-pad to 8x8 (conv2's padding=1) via two concatenations (no mask multiply).
    zrow = jnp.zeros((Bt, 1, 6, 64), jnp.float32)
    h1p = jnp.concatenate([zrow, h1, zrow], axis=1)    # (Bt, 8, 6, 64)
    zcol = jnp.zeros((Bt, 8, 1, 64), jnp.float32)
    h1p = jnp.concatenate([zcol, h1p, zcol], axis=2)   # (Bt, 8, 8, 64)

    # ---- conv2 as a single im2col matmul, K = 9*64 = 576, built as a value ----
    cols = jnp.concatenate(
        [h1p[:, dh:dh + 6, dw:dw + 6, :] for dh in range(3) for dw in range(3)],
        axis=-1)                                       # (Bt, 6, 6, 576) lane-dense
    cols = cols.reshape(Bt * 36, 576)
    acc2 = jnp.dot(cols.astype(w2_ref.dtype), w2_ref[...],
                   preferred_element_type=jnp.float32)  # (Bt*36, 64)
    h2 = jnp.maximum(acc2 + b2_ref[...], 0.0).reshape(Bt, 6, 6, 64)

    # ---- maxpool 2x2 (stride 2) fused with the flatten into a (Bt, 576) value ----
    # Feature order is (i, j, c); fc1's weight rows were permuted in the wrapper to
    # match PyTorch's (c, i, j) flatten of the NCHW tensor.
    pooled = []
    for i in range(3):
        rmax = jnp.maximum(h2[:, 2 * i, :, :], h2[:, 2 * i + 1, :, :])   # (Bt, 6, 64)
        for j in range(3):
            pooled.append(jnp.maximum(rmax[:, 2 * j, :], rmax[:, 2 * j + 1, :]))
    feat = jnp.concatenate(pooled, axis=-1)            # (Bt, 576)

    # ---- fc1 -> [dropout=identity] -> ReLU -> fc3 -> [dropout=identity] -> ReLU -> fc4 ----
    h = jnp.dot(feat.astype(wf1_ref.dtype), wf1_ref[...],
                preferred_element_type=jnp.float32) + bf1_ref[...]
    h = jnp.maximum(h, 0.0)
    h = jnp.dot(h.astype(wf3_ref.dtype), wf3_ref[...],
                preferred_element_type=jnp.float32) + bf3_ref[...]
    h = jnp.maximum(h, 0.0)
    out_ref[...] = (jnp.dot(h.astype(wf4_ref.dtype), wf4_ref[...],
                            preferred_element_type=jnp.float32) + bf4_ref[...])


@partial(jax.jit, static_argnames=("use_bf16",))
def net_forward(x_nchw, params, use_bf16=False):
    """x_nchw: (B, 1, 6, 6) float32, PyTorch NCHW convention. Params in PyTorch layouts."""
    B = x_nchw.shape[0]
    H1 = params["fc1_w"].shape[0]
    H3 = params["fc3_w"].shape[0]
    out_dim = params["fc4_w"].shape[0]
    OUTP = 128 * pl.cdiv(out_dim, 128)   # lane-dense final store

    # Batch block: 64 keeps per-block VMEM (im2col value ~83 KiB/elem) well inside
    # every generation's scoped budget (incl. v7x's 64 MiB physical VMEM).
    Bt = min(64, B)
    nb = pl.cdiv(B, Bt)
    Bp = nb * Bt

    # NCHW -> NHWC, pad batch to a multiple of Bt and spatial dims by 1 (conv1 halo).
    x_nhwc = jnp.transpose(x_nchw, (0, 2, 3, 1)).astype(jnp.float32)     # (B, 6, 6, 1)
    x1p = jnp.pad(x_nhwc, ((0, Bp - B), (1, 1), (1, 1), (0, 0)))         # (Bp, 8, 8, 1)

    # --- one-time weight re-layouts (host/XLA side, outside the kernel) ---
    wdt = jnp.bfloat16 if use_bf16 else jnp.float32   # MXU operand dtype
    # conv1 (64,1,3,3) -> (3,3,64); stays f32 (VPU path).
    w1 = jnp.transpose(params["c1_w"][:, 0], (1, 2, 0))
    b1 = params["c1_b"].reshape(1, 64)
    # conv2 (64,64,3,3) -> (kh,kw,cin,cout) -> (576, 64); K order (kh, kw, cin).
    w2 = jnp.transpose(params["c2_w"], (2, 3, 1, 0)).reshape(9 * 64, 64).astype(wdt)
    b2 = params["c2_b"].reshape(1, 64)
    # fc1 (H1, 576) with torch (c,i,j) input order -> (576, H1) with kernel (i,j,c) order.
    wf1 = jnp.transpose(params["fc1_w"].reshape(H1, 64, 3, 3),
                        (2, 3, 1, 0)).reshape(576, H1).astype(wdt)
    bf1 = params["fc1_b"].reshape(1, H1)
    wf3 = params["fc3_w"].T.astype(wdt)                                  # (H1, H3)
    bf3 = params["fc3_b"].reshape(1, H3)
    # fc4 columns zero-padded to OUTP so the kernel's final store is unmasked.
    wf4 = jnp.pad(params["fc4_w"].T, ((0, 0), (0, OUTP - out_dim))).astype(wdt)
    bf4 = jnp.pad(params["fc4_b"], (0, OUTP - out_dim)).reshape(1, OUTP)

    const2 = lambda b: (0, 0)
    out = pl.pallas_call(
        fused_net_kernel,
        out_shape=jax.ShapeDtypeStruct((Bp, OUTP), jnp.float32),
        grid_spec=pltpu.PrefetchScalarGridSpec(
            num_scalar_prefetch=0,
            grid=(nb,),
            in_specs=[
                pl.BlockSpec((Bt, 8, 8, 1), lambda b: (b, 0, 0, 0)),   # x (batch-blocked)
                pl.BlockSpec((3, 3, 64), lambda b: (0, 0, 0)),         # w1
                pl.BlockSpec((1, 64), const2),                         # b1
                pl.BlockSpec((576, 64), const2),                       # w2
                pl.BlockSpec((1, 64), const2),                         # b2
                pl.BlockSpec((576, H1), const2),                       # wf1
                pl.BlockSpec((1, H1), const2),                         # bf1
                pl.BlockSpec((H1, H3), const2),                        # wf3
                pl.BlockSpec((1, H3), const2),                         # bf3
                pl.BlockSpec((H3, OUTP), const2),                      # wf4
                pl.BlockSpec((1, OUTP), const2),                       # bf4
            ],
            out_specs=pl.BlockSpec((Bt, OUTP), lambda b: (b, 0)),
        ),
        compiler_params=pltpu.CompilerParams(
            dimension_semantics=("parallel",),
            vmem_limit_bytes=32 * 1024 * 1024,
        ),
    )(x1p, w1, b1, w2, b2, wf1, bf1, wf3, bf3, wf4, bf4)
    return out[:B, :out_dim]


def reference_forward(x_nchw, params):
    """Pure-JAX/XLA reference matching the PyTorch module (dropout = identity)."""
    y = jax.lax.conv_general_dilated(
        x_nchw, params["c1_w"], window_strides=(1, 1), padding=((1, 1), (1, 1)),
        dimension_numbers=("NCHW", "OIHW", "NCHW"))
    y = jax.nn.relu(y + params["c1_b"][None, :, None, None])
    y = jax.lax.conv_general_dilated(
        y, params["c2_w"], window_strides=(1, 1), padding=((1, 1), (1, 1)),
        dimension_numbers=("NCHW", "OIHW", "NCHW"))
    y = jax.nn.relu(y + params["c2_b"][None, :, None, None])
    y = jax.lax.reduce_window(y, -jnp.inf, jax.lax.max,
                              (1, 1, 2, 2), (1, 1, 2, 2), "VALID")
    y = y.reshape(y.shape[0], -1)                     # NCHW flatten: (c, i, j)
    y = jax.nn.relu(y @ params["fc1_w"].T + params["fc1_b"])
    y = jax.nn.relu(y @ params["fc3_w"].T + params["fc3_b"])
    return y @ params["fc4_w"].T + params["fc4_b"]


def init_params(key, hidden_1, hidden_3, out_dim):
    """Deterministic synthetic parameters, stored in PyTorch layouts:
    conv weight (Cout, Cin, Kh, Kw); linear weight (out, in); bias (dim,)."""
    ks = jax.random.split(key, 10)
    s = 0.05
    d_in = 64 * 3 * 3
    return {
        "c1_w": s * jax.random.normal(ks[0], (64, 1, 3, 3), jnp.float32),
        "c1_b": s * jax.random.normal(ks[1], (64,), jnp.float32),
        "c2_w": s * jax.random.normal(ks[2], (64, 64, 3, 3), jnp.float32),
        "c2_b": s * jax.random.normal(ks[3], (64,), jnp.float32),
        "fc1_w": s * jax.random.normal(ks[4], (hidden_1, d_in), jnp.float32),
        "fc1_b": s * jax.random.normal(ks[5], (hidden_1,), jnp.float32),
        "fc3_w": s * jax.random.normal(ks[6], (hidden_3, hidden_1), jnp.float32),
        "fc3_b": s * jax.random.normal(ks[7], (hidden_3,), jnp.float32),
        "fc4_w": s * jax.random.normal(ks[8], (out_dim, hidden_3), jnp.float32),
        "fc4_b": s * jax.random.normal(ks[9], (out_dim,), jnp.float32),
    }


if __name__ == "__main__":
    key = jax.random.PRNGKey(0)
    k_param, k_x = jax.random.split(key)

    B = 2
    hidden_1, hidden_3, out_dim = 128, 64, 10   # input_dim / hidden_2 are unused by forward

    params = init_params(k_param, hidden_1, hidden_3, out_dim)
    x = jax.random.normal(k_x, (B, 1, 6, 6), jnp.float32)   # NCHW, like PyTorch

    y = net_forward(x, params)            # f32 path (bit-comparable to PyTorch semantics)
    y = jax.block_until_ready(y)
    assert y.shape == (B, out_dim)
    assert bool(jnp.all(jnp.isfinite(y)))

    y_ref = jax.block_until_ready(reference_forward(x, params))
    max_err = float(jnp.max(jnp.abs(y - y_ref)))
    assert max_err < 1e-2, f"kernel/reference mismatch: max abs err {max_err}"

    print("KERNEL_OK")
</pallas_src>

<mosaic_0001>
module attributes {stable_mosaic.version = 11 : i64} {
  func.func @fused_net_kernel(%arg0: i32, %arg1: memref<2x8x8x1xf32, #tpu.memory_space<vmem>>, %arg2: memref<3x3x64xf32, #tpu.memory_space<vmem>>, %arg3: memref<1x64xf32, #tpu.memory_space<vmem>>, %arg4: memref<576x64xf32, #tpu.memory_space<vmem>>, %arg5: memref<1x64xf32, #tpu.memory_space<vmem>>, %arg6: memref<576x128xf32, #tpu.memory_space<vmem>>, %arg7: memref<1x128xf32, #tpu.memory_space<vmem>>, %arg8: memref<128x64xf32, #tpu.memory_space<vmem>>, %arg9: memref<1x64xf32, #tpu.memory_space<vmem>>, %arg10: memref<64x128xf32, #tpu.memory_space<vmem>>, %arg11: memref<1x128xf32, #tpu.memory_space<vmem>>, %arg12: memref<2x128xf32, #tpu.memory_space<vmem>>) attributes {dimension_semantics = [#tpu.dimension_semantics<parallel>], iteration_bounds = array<i64: 1>, scalar_prefetch = 0 : i64, scratch_operands = 0 : i64, tpu.core_type = #tpu.core_type<tc>, window_params = [{transform_indices = @transform_0, window_bounds = array<i64: 2, 8, 8, 1>}, {pipeline_mode = #tpu.pipeline_mode<synchronous>, transform_indices = @transform_1, window_bounds = array<i64: 3, 3, 64>}, {pipeline_mode = #tpu.pipeline_mode<synchronous>, transform_indices = @transform_2, window_bounds = array<i64: 1, 64>}, {pipeline_mode = #tpu.pipeline_mode<synchronous>, transform_indices = @transform_3, window_bounds = array<i64: 576, 64>}, {pipeline_mode = #tpu.pipeline_mode<synchronous>, transform_indices = @transform_4, window_bounds = array<i64: 1, 64>}, {pipeline_mode = #tpu.pipeline_mode<synchronous>, transform_indices = @transform_5, window_bounds = array<i64: 576, 128>}, {pipeline_mode = #tpu.pipeline_mode<synchronous>, transform_indices = @transform_6, window_bounds = array<i64: 1, 128>}, {pipeline_mode = #tpu.pipeline_mode<synchronous>, transform_indices = @transform_7, window_bounds = array<i64: 128, 64>}, {pipeline_mode = #tpu.pipeline_mode<synchronous>, transform_indices = @transform_8, window_bounds = array<i64: 1, 64>}, {pipeline_mode = #tpu.pipeline_mode<synchronous>, transform_indices = @transform_9, window_bounds = array<i64: 64, 128>}, {pipeline_mode = #tpu.pipeline_mode<synchronous>, transform_indices = @transform_10, window_bounds = array<i64: 1, 128>}, {transform_indices = @transform_11, window_bounds = array<i64: 2, 128>}]} {
    %c0 = arith.constant 0 : index
    %c0_0 = arith.constant 0 : index
    %c0_1 = arith.constant 0 : index
    %c0_2 = arith.constant 0 : index
    %0 = vector.load %arg1[%c0, %c0_0, %c0_1, %c0_2] : memref<2x8x8x1xf32, #tpu.memory_space<vmem>>, vector<2x8x8x1xf32>
    %c0_3 = arith.constant 0 : index
    %c0_4 = arith.constant 0 : index
    %c0_5 = arith.constant 0 : index
    %1 = vector.load %arg2[%c0_3, %c0_4, %c0_5] : memref<3x3x64xf32, #tpu.memory_space<vmem>>, vector<3x3x64xf32>
    %cst = arith.constant 0.000000e+00 : f32
    %2 = vector.broadcast %cst : f32 to vector<2x6x6x64xf32>
    %3 = vector.extract_strided_slice %0 {offsets = [0, 0, 0, 0], sizes = [2, 6, 6, 1], strides = [1, 1, 1, 1]} : vector<2x8x8x1xf32> to vector<2x6x6x1xf32>
    %4 = vector.extract_strided_slice %1 {offsets = [0, 0, 0], sizes = [1, 1, 64], strides = [1, 1, 1]} : vector<3x3x64xf32> to vector<1x1x64xf32>
    %5 = vector.shape_cast %4 : vector<1x1x64xf32> to vector<1x1x1x64xf32>
    %6 = vector.broadcast %3 : vector<2x6x6x1xf32> to vector<2x6x6x64xf32>
    %7 = vector.broadcast %5 : vector<1x1x1x64xf32> to vector<2x6x6x64xf32>
    %8 = arith.mulf %6, %7 : vector<2x6x6x64xf32>
    %9 = arith.addf %2, %8 : vector<2x6x6x64xf32>
    %10 = vector.extract_strided_slice %0 {offsets = [0, 0, 1, 0], sizes = [2, 6, 6, 1], strides = [1, 1, 1, 1]} : vector<2x8x8x1xf32> to vector<2x6x6x1xf32>
    %11 = vector.extract_strided_slice %1 {offsets = [0, 1, 0], sizes = [1, 1, 64], strides = [1, 1, 1]} : vector<3x3x64xf32> to vector<1x1x64xf32>
    %12 = vector.shape_cast %11 : vector<1x1x64xf32> to vector<1x1x1x64xf32>
    %13 = vector.broadcast %10 : vector<2x6x6x1xf32> to vector<2x6x6x64xf32>
    %14 = vector.broadcast %12 : vector<1x1x1x64xf32> to vector<2x6x6x64xf32>
    %15 = arith.mulf %13, %14 : vector<2x6x6x64xf32>
    %16 = arith.addf %9, %15 : vector<2x6x6x64xf32>
    %17 = vector.extract_strided_slice %0 {offsets = [0, 0, 2, 0], sizes = [2, 6, 6, 1], strides = [1, 1, 1, 1]} : vector<2x8x8x1xf32> to vector<2x6x6x1xf32>
    %18 = vector.extract_strided_slice %1 {offsets = [0, 2, 0], sizes = [1, 1, 64], strides = [1, 1, 1]} : vector<3x3x64xf32> to vector<1x1x64xf32>
    %19 = vector.shape_cast %18 : vector<1x1x64xf32> to vector<1x1x1x64xf32>
    %20 = vector.broadcast %17 : vector<2x6x6x1xf32> to vector<2x6x6x64xf32>
    %21 = vector.broadcast %19 : vector<1x1x1x64xf32> to vector<2x6x6x64xf32>
    %22 = arith.mulf %20, %21 : vector<2x6x6x64xf32>
    %23 = arith.addf %16, %22 : vector<2x6x6x64xf32>
    %24 = vector.extract_strided_slice %0 {offsets = [0, 1, 0, 0], sizes = [2, 6, 6, 1], strides = [1, 1, 1, 1]} : vector<2x8x8x1xf32> to vector<2x6x6x1xf32>
    %25 = vector.extract_strided_slice %1 {offsets = [1, 0, 0], sizes = [1, 1, 64], strides = [1, 1, 1]} : vector<3x3x64xf32> to vector<1x1x64xf32>
    %26 = vector.shape_cast %25 : vector<1x1x64xf32> to vector<1x1x1x64xf32>
    %27 = vector.broadcast %24 : vector<2x6x6x1xf32> to vector<2x6x6x64xf32>
    %28 = vector.broadcast %26 : vector<1x1x1x64xf32> to vector<2x6x6x64xf32>
    %29 = arith.mulf %27, %28 : vector<2x6x6x64xf32>
    %30 = arith.addf %23, %29 : vector<2x6x6x64xf32>
    %31 = vector.extract_strided_slice %0 {offsets = [0, 1, 1, 0], sizes = [2, 6, 6, 1], strides = [1, 1, 1, 1]} : vector<2x8x8x1xf32> to vector<2x6x6x1xf32>
    %32 = vector.extract_strided_slice %1 {offsets = [1, 1, 0], sizes = [1, 1, 64], strides = [1, 1, 1]} : vector<3x3x64xf32> to vector<1x1x64xf32>
    %33 = vector.shape_cast %32 : vector<1x1x64xf32> to vector<1x1x1x64xf32>
    %34 = vector.broadcast %31 : vector<2x6x6x1xf32> to vector<2x6x6x64xf32>
    %35 = vector.broadcast %33 : vector<1x1x1x64xf32> to vector<2x6x6x64xf32>
    %36 = arith.mulf %34, %35 : vector<2x6x6x64xf32>
    %37 = arith.addf %30, %36 : vector<2x6x6x64xf32>
    %38 = vector.extract_strided_slice %0 {offsets = [0, 1, 2, 0], sizes = [2, 6, 6, 1], strides = [1, 1, 1, 1]} : vector<2x8x8x1xf32> to vector<2x6x6x1xf32>
    %39 = vector.extract_strided_slice %1 {offsets = [1, 2, 0], sizes = [1, 1, 64], strides = [1, 1, 1]} : vector<3x3x64xf32> to vector<1x1x64xf32>
    %40 = vector.shape_cast %39 : vector<1x1x64xf32> to vector<1x1x1x64xf32>
    %41 = vector.broadcast %38 : vector<2x6x6x1xf32> to vector<2x6x6x64xf32>
    %42 = vector.broadcast %40 : vector<1x1x1x64xf32> to vector<2x6x6x64xf32>
    %43 = arith.mulf %41, %42 : vector<2x6x6x64xf32>
    %44 = arith.addf %37, %43 : vector<2x6x6x64xf32>
    %45 = vector.extract_strided_slice %0 {offsets = [0, 2, 0, 0], sizes = [2, 6, 6, 1], strides = [1, 1, 1, 1]} : vector<2x8x8x1xf32> to vector<2x6x6x1xf32>
    %46 = vector.extract_strided_slice %1 {offsets = [2, 0, 0], sizes = [1, 1, 64], strides = [1, 1, 1]} : vector<3x3x64xf32> to vector<1x1x64xf32>
    %47 = vector.shape_cast %46 : vector<1x1x64xf32> to vector<1x1x1x64xf32>
    %48 = vector.broadcast %45 : vector<2x6x6x1xf32> to vector<2x6x6x64xf32>
    %49 = vector.broadcast %47 : vector<1x1x1x64xf32> to vector<2x6x6x64xf32>
    %50 = arith.mulf %48, %49 : vector<2x6x6x64xf32>
    %51 = arith.addf %44, %50 : vector<2x6x6x64xf32>
    %52 = vector.extract_strided_slice %0 {offsets = [0, 2, 1, 0], sizes = [2, 6, 6, 1], strides = [1, 1, 1, 1]} : vector<2x8x8x1xf32> to vector<2x6x6x1xf32>
    %53 = vector.extract_strided_slice %1 {offsets = [2, 1, 0], sizes = [1, 1, 64], strides = [1, 1, 1]} : vector<3x3x64xf32> to vector<1x1x64xf32>
    %54 = vector.shape_cast %53 : vector<1x1x64xf32> to vector<1x1x1x64xf32>
    %55 = vector.broadcast %52 : vector<2x6x6x1xf32> to vector<2x6x6x64xf32>
    %56 = vector.broadcast %54 : vector<1x1x1x64xf32> to vector<2x6x6x64xf32>
    %57 = arith.mulf %55, %56 : vector<2x6x6x64xf32>
    %58 = arith.addf %51, %57 : vector<2x6x6x64xf32>
    %59 = vector.extract_strided_slice %0 {offsets = [0, 2, 2, 0], sizes = [2, 6, 6, 1], strides = [1, 1, 1, 1]} : vector<2x8x8x1xf32> to vector<2x6x6x1xf32>
    %60 = vector.extract_strided_slice %1 {offsets = [2, 2, 0], sizes = [1, 1, 64], strides = [1, 1, 1]} : vector<3x3x64xf32> to vector<1x1x64xf32>
    %61 = vector.shape_cast %60 : vector<1x1x64xf32> to vector<1x1x1x64xf32>
    %62 = vector.broadcast %59 : vector<2x6x6x1xf32> to vector<2x6x6x64xf32>
    %63 = vector.broadcast %61 : vector<1x1x1x64xf32> to vector<2x6x6x64xf32>
    %64 = arith.mulf %62, %63 : vector<2x6x6x64xf32>
    %65 = arith.addf %58, %64 : vector<2x6x6x64xf32>
    %c0_6 = arith.constant 0 : index
    %c0_7 = arith.constant 0 : index
    %66 = vector.load %arg3[%c0_6, %c0_7] : memref<1x64xf32, #tpu.memory_space<vmem>>, vector<1x64xf32>
    %67 = vector.shape_cast %66 : vector<1x64xf32> to vector<1x1x1x64xf32>
    %68 = vector.broadcast %67 : vector<1x1x1x64xf32> to vector<2x6x6x64xf32>
    %69 = arith.addf %65, %68 : vector<2x6x6x64xf32>
    %cst_8 = arith.constant 0.000000e+00 : f32
    %70 = vector.broadcast %cst_8 : f32 to vector<2x6x6x64xf32>
    %71 = arith.maximumf %69, %70 : vector<2x6x6x64xf32>
    %cst_9 = arith.constant 0.000000e+00 : f32
    %72 = vector.broadcast %cst_9 : f32 to vector<2x1x6x64xf32>
    %73 = tpu.concatenate %72, %71, %72 in 1 : vector<2x1x6x64xf32>, vector<2x6x6x64xf32>, vector<2x1x6x64xf32> -> vector<2x8x6x64xf32>
    %cst_10 = arith.constant 0.000000e+00 : f32
    %74 = vector.broadcast %cst_10 : f32 to vector<2x8x1x64xf32>
    %75 = tpu.concatenate %74, %73, %74 in 2 : vector<2x8x1x64xf32>, vector<2x8x6x64xf32>, vector<2x8x1x64xf32> -> vector<2x8x8x64xf32>
    %76 = vector.extract_strided_slice %75 {offsets = [0, 0, 0, 0], sizes = [2, 6, 6, 64], strides = [1, 1, 1, 1]} : vector<2x8x8x64xf32> to vector<2x6x6x64xf32>
    %77 = vector.extract_strided_slice %75 {offsets = [0, 0, 1, 0], sizes = [2, 6, 6, 64], strides = [1, 1, 1, 1]} : vector<2x8x8x64xf32> to vector<2x6x6x64xf32>
    %78 = vector.extract_strided_slice %75 {offsets = [0, 0, 2, 0], sizes = [2, 6, 6, 64], strides = [1, 1, 1, 1]} : vector<2x8x8x64xf32> to vector<2x6x6x64xf32>
    %79 = vector.extract_strided_slice %75 {offsets = [0, 1, 0, 0], sizes = [2, 6, 6, 64], strides = [1, 1, 1, 1]} : vector<2x8x8x64xf32> to vector<2x6x6x64xf32>
    %80 = vector.extract_strided_slice %75 {offsets = [0, 1, 1, 0], sizes = [2, 6, 6, 64], strides = [1, 1, 1, 1]} : vector<2x8x8x64xf32> to vector<2x6x6x64xf32>
    %81 = vector.extract_strided_slice %75 {offsets = [0, 1, 2, 0], sizes = [2, 6, 6, 64], strides = [1, 1, 1, 1]} : vector<2x8x8x64xf32> to vector<2x6x6x64xf32>
    %82 = vector.extract_strided_slice %75 {offsets = [0, 2, 0, 0], sizes = [2, 6, 6, 64], strides = [1, 1, 1, 1]} : vector<2x8x8x64xf32> to vector<2x6x6x64xf32>
    %83 = vector.extract_strided_slice %75 {offsets = [0, 2, 1, 0], sizes = [2, 6, 6, 64], strides = [1, 1, 1, 1]} : vector<2x8x8x64xf32> to vector<2x6x6x64xf32>
    %84 = vector.extract_strided_slice %75 {offsets = [0, 2, 2, 0], sizes = [2, 6, 6, 64], strides = [1, 1, 1, 1]} : vector<2x8x8x64xf32> to vector<2x6x6x64xf32>
    %85 = tpu.concatenate %76, %77, %78, %79, %80, %81, %82, %83, %84 in 3 : vector<2x6x6x64xf32>, vector<2x6x6x64xf32>, vector<2x6x6x64xf32>, vector<2x6x6x64xf32>, vector<2x6x6x64xf32>, vector<2x6x6x64xf32>, vector<2x6x6x64xf32>, vector<2x6x6x64xf32>, vector<2x6x6x64xf32> -> vector<2x6x6x576xf32>
    %86 = vector.shape_cast %85 : vector<2x6x6x576xf32> to vector<72x576xf32>
    %c0_11 = arith.constant 0 : index
    %c0_12 = arith.constant 0 : index
    %87 = vector.load %arg4[%c0_11, %c0_12] : memref<576x64xf32, #tpu.memory_space<vmem>>, vector<576x64xf32>
    %cst_13 = arith.constant dense<0.000000e+00> : vector<72x64xf32>
    %88 = tpu.matmul %86, %87, %cst_13 {dimension_numbers = #tpu.dot_dimension_numbers<[1], [0], [0], [1], [0, 0, 1, 1], [], []>} : vector<72x576xf32>, vector<576x64xf32>, vector<72x64xf32> -> vector<72x64xf32>
    %c0_14 = arith.constant 0 : index
    %c0_15 = arith.constant 0 : index
    %89 = vector.load %arg5[%c0_14, %c0_15] : memref<1x64xf32, #tpu.memory_space<vmem>>, vector<1x64xf32>
    %90 = vector.broadcast %89 : vector<1x64xf32> to vector<72x64xf32>
    %91 = arith.addf %88, %90 : vector<72x64xf32>
    %cst_16 = arith.constant 0.000000e+00 : f32
    %92 = vector.broadcast %cst_16 : f32 to vector<72x64xf32>
    %93 = arith.maximumf %91, %92 : vector<72x64xf32>
    %94 = vector.shape_cast %93 : vector<72x64xf32> to vector<2x6x6x64xf32>
    %95 = vector.extract_strided_slice %94 {offsets = [0, 0, 0, 0], sizes = [2, 1, 6, 64], strides = [1, 1, 1, 1]} : vector<2x6x6x64xf32> to vector<2x1x6x64xf32>
    %96 = vector.shape_cast %95 : vector<2x1x6x64xf32> to vector<2x6x64xf32>
    %97 = vector.extract_strided_slice %94 {offsets = [0, 1, 0, 0], sizes = [2, 1, 6, 64], strides = [1, 1, 1, 1]} : vector<2x6x6x64xf32> to vector<2x1x6x64xf32>
    %98 = vector.shape_cast %97 : vector<2x1x6x64xf32> to vector<2x6x64xf32>
    %99 = arith.maximumf %96, %98 : vector<2x6x64xf32>
    %100 = vector.extract_strided_slice %99 {offsets = [0, 0, 0], sizes = [2, 1, 64], strides = [1, 1, 1]} : vector<2x6x64xf32> to vector<2x1x64xf32>
    %101 = vector.shape_cast %100 : vector<2x1x64xf32> to vector<2x64xf32>
    %102 = vector.extract_strided_slice %99 {offsets = [0, 1, 0], sizes = [2, 1, 64], strides = [1, 1, 1]} : vector<2x6x64xf32> to vector<2x1x64xf32>
    %103 = vector.shape_cast %102 : vector<2x1x64xf32> to vector<2x64xf32>
    %104 = arith.maximumf %101, %103 : vector<2x64xf32>
    %105 = vector.extract_strided_slice %99 {offsets = [0, 2, 0], sizes = [2, 1, 64], strides = [1, 1, 1]} : vector<2x6x64xf32> to vector<2x1x64xf32>
    %106 = vector.shape_cast %105 : vector<2x1x64xf32> to vector<2x64xf32>
    %107 = vector.extract_strided_slice %99 {offsets = [0, 3, 0], sizes = [2, 1, 64], strides = [1, 1, 1]} : vector<2x6x64xf32> to vector<2x1x64xf32>
    %108 = vector.shape_cast %107 : vector<2x1x64xf32> to vector<2x64xf32>
    %109 = arith.maximumf %106, %108 : vector<2x64xf32>
    %110 = vector.extract_strided_slice %99 {offsets = [0, 4, 0], sizes = [2, 1, 64], strides = [1, 1, 1]} : vector<2x6x64xf32> to vector<2x1x64xf32>
    %111 = vector.shape_cast %110 : vector<2x1x64xf32> to vector<2x64xf32>
    %112 = vector.extract_strided_slice %99 {offsets = [0, 5, 0], sizes = [2, 1, 64], strides = [1, 1, 1]} : vector<2x6x64xf32> to vector<2x1x64xf32>
    %113 = vector.shape_cast %112 : vector<2x1x64xf32> to vector<2x64xf32>
    %114 = arith.maximumf %111, %113 : vector<2x64xf32>
    %115 = vector.extract_strided_slice %94 {offsets = [0, 2, 0, 0], sizes = [2, 1, 6, 64], strides = [1, 1, 1, 1]} : vector<2x6x6x64xf32> to vector<2x1x6x64xf32>
    %116 = vector.shape_cast %115 : vector<2x1x6x64xf32> to vector<2x6x64xf32>
    %117 = vector.extract_strided_slice %94 {offsets = [0, 3, 0, 0], sizes = [2, 1, 6, 64], strides = [1, 1, 1, 1]} : vector<2x6x6x64xf32> to vector<2x1x6x64xf32>
    %118 = vector.shape_cast %117 : vector<2x1x6x64xf32> to vector<2x6x64xf32>
    %119 = arith.maximumf %116, %118 : vector<2x6x64xf32>
    %120 = vector.extract_strided_slice %119 {offsets = [0, 0, 0], sizes = [2, 1, 64], strides = [1, 1, 1]} : vector<2x6x64xf32> to vector<2x1x64xf32>
    %121 = vector.shape_cast %120 : vector<2x1x64xf32> to vector<2x64xf32>
    %122 = vector.extract_strided_slice %119 {offsets = [0, 1, 0], sizes = [2, 1, 64], strides = [1, 1, 1]} : vector<2x6x64xf32> to vector<2x1x64xf32>
    %123 = vector.shape_cast %122 : vector<2x1x64xf32> to vector<2x64xf32>
    %124 = arith.maximumf %121, %123 : vector<2x64xf32>
    %125 = vector.extract_strided_slice %119 {offsets = [0, 2, 0], sizes = [2, 1, 64], strides = [1, 1, 1]} : vector<2x6x64xf32> to vector<2x1x64xf32>
    %126 = vector.shape_cast %125 : vector<2x1x64xf32> to vector<2x64xf32>
    %127 = vector.extract_strided_slice %119 {offsets = [0, 3, 0], sizes = [2, 1, 64], strides = [1, 1, 1]} : vector<2x6x64xf32> to vector<2x1x64xf32>
    %128 = vector.shape_cast %127 : vector<2x1x64xf32> to vector<2x64xf32>
    %129 = arith.maximumf %126, %128 : vector<2x64xf32>
    %130 = vector.extract_strided_slice %119 {offsets = [0, 4, 0], sizes = [2, 1, 64], strides = [1, 1, 1]} : vector<2x6x64xf32> to vector<2x1x64xf32>
    %131 = vector.shape_cast %130 : vector<2x1x64xf32> to vector<2x64xf32>
    %132 = vector.extract_strided_slice %119 {offsets = [0, 5, 0], sizes = [2, 1, 64], strides = [1, 1, 1]} : vector<2x6x64xf32> to vector<2x1x64xf32>
    %133 = vector.shape_cast %132 : vector<2x1x64xf32> to vector<2x64xf32>
    %134 = arith.maximumf %131, %133 : vector<2x64xf32>
    %135 = vector.extract_strided_slice %94 {offsets = [0, 4, 0, 0], sizes = [2, 1, 6, 64], strides = [1, 1, 1, 1]} : vector<2x6x6x64xf32> to vector<2x1x6x64xf32>
    %136 = vector.shape_cast %135 : vector<2x1x6x64xf32> to vector<2x6x64xf32>
    %137 = vector.extract_strided_slice %94 {offsets = [0, 5, 0, 0], sizes = [2, 1, 6, 64], strides = [1, 1, 1, 1]} : vector<2x6x6x64xf32> to vector<2x1x6x64xf32>
    %138 = vector.shape_cast %137 : vector<2x1x6x64xf32> to vector<2x6x64xf32>
    %139 = arith.maximumf %136, %138 : vector<2x6x64xf32>
    %140 = vector.extract_strided_slice %139 {offsets = [0, 0, 0], sizes = [2, 1, 64], strides = [1, 1, 1]} : vector<2x6x64xf32> to vector<2x1x64xf32>
    %141 = vector.shape_cast %140 : vector<2x1x64xf32> to vector<2x64xf32>
    %142 = vector.extract_strided_slice %139 {offsets = [0, 1, 0], sizes = [2, 1, 64], strides = [1, 1, 1]} : vector<2x6x64xf32> to vector<2x1x64xf32>
    %143 = vector.shape_cast %142 : vector<2x1x64xf32> to vector<2x64xf32>
    %144 = arith.maximumf %141, %143 : vector<2x64xf32>
    %145 = vector.extract_strided_slice %139 {offsets = [0, 2, 0], sizes = [2, 1, 64], strides = [1, 1, 1]} : vector<2x6x64xf32> to vector<2x1x64xf32>
    %146 = vector.shape_cast %145 : vector<2x1x64xf32> to vector<2x64xf32>
    %147 = vector.extract_strided_slice %139 {offsets = [0, 3, 0], sizes = [2, 1, 64], strides = [1, 1, 1]} : vector<2x6x64xf32> to vector<2x1x64xf32>
    %148 = vector.shape_cast %147 : vector<2x1x64xf32> to vector<2x64xf32>
    %149 = arith.maximumf %146, %148 : vector<2x64xf32>
    %150 = vector.extract_strided_slice %139 {offsets = [0, 4, 0], sizes = [2, 1, 64], strides = [1, 1, 1]} : vector<2x6x64xf32> to vector<2x1x64xf32>
    %151 = vector.shape_cast %150 : vector<2x1x64xf32> to vector<2x64xf32>
    %152 = vector.extract_strided_slice %139 {offsets = [0, 5, 0], sizes = [2, 1, 64], strides = [1, 1, 1]} : vector<2x6x64xf32> to vector<2x1x64xf32>
    %153 = vector.shape_cast %152 : vector<2x1x64xf32> to vector<2x64xf32>
    %154 = arith.maximumf %151, %153 : vector<2x64xf32>
    %155 = tpu.concatenate %104, %109, %114, %124, %129, %134, %144, %149, %154 in 1 : vector<2x64xf32>, vector<2x64xf32>, vector<2x64xf32>, vector<2x64xf32>, vector<2x64xf32>, vector<2x64xf32>, vector<2x64xf32>, vector<2x64xf32>, vector<2x64xf32> -> vector<2x576xf32>
    %c0_17 = arith.constant 0 : index
    %c0_18 = arith.constant 0 : index
    %156 = vector.load %arg6[%c0_17, %c0_18] : memref<576x128xf32, #tpu.memory_space<vmem>>, vector<576x128xf32>
    %cst_19 = arith.constant dense<0.000000e+00> : vector<2x128xf32>
    %157 = tpu.matmul %155, %156, %cst_19 {dimension_numbers = #tpu.dot_dimension_numbers<[1], [0], [0], [1], [0, 0, 1, 1], [], []>} : vector<2x576xf32>, vector<576x128xf32>, vector<2x128xf32> -> vector<2x128xf32>
    %c0_20 = arith.constant 0 : index
    %c0_21 = arith.constant 0 : index
    %158 = vector.load %arg7[%c0_20, %c0_21] : memref<1x128xf32, #tpu.memory_space<vmem>>, vector<1x128xf32>
    %159 = vector.broadcast %158 : vector<1x128xf32> to vector<2x128xf32>
    %160 = arith.addf %157, %159 : vector<2x128xf32>
    %cst_22 = arith.constant 0.000000e+00 : f32
    %161 = vector.broadcast %cst_22 : f32 to vector<2x128xf32>
    %162 = arith.maximumf %160, %161 : vector<2x128xf32>
    %c0_23 = arith.constant 0 : index
    %c0_24 = arith.constant 0 : index
    %163 = vector.load %arg8[%c0_23, %c0_24] : memref<128x64xf32, #tpu.memory_space<vmem>>, vector<128x64xf32>
    %cst_25 = arith.constant dense<0.000000e+00> : vector<2x64xf32>
    %164 = tpu.matmul %162, %163, %cst_25 {dimension_numbers = #tpu.dot_dimension_numbers<[1], [0], [0], [1], [0, 0, 1, 1], [], []>} : vector<2x128xf32>, vector<128x64xf32>, vector<2x64xf32> -> vector<2x64xf32>
    %c0_26 = arith.constant 0 : index
    %c0_27 = arith.constant 0 : index
    %165 = vector.load %arg9[%c0_26, %c0_27] : memref<1x64xf32, #tpu.memory_space<vmem>>, vector<1x64xf32>
    %166 = vector.broadcast %165 : vector<1x64xf32> to vector<2x64xf32>
    %167 = arith.addf %164, %166 : vector<2x64xf32>
    %cst_28 = arith.constant 0.000000e+00 : f32
    %168 = vector.broadcast %cst_28 : f32 to vector<2x64xf32>
    %169 = arith.maximumf %167, %168 : vector<2x64xf32>
    %c0_29 = arith.constant 0 : index
    %c0_30 = arith.constant 0 : index
    %170 = vector.load %arg10[%c0_29, %c0_30] : memref<64x128xf32, #tpu.memory_space<vmem>>, vector<64x128xf32>
    %cst_31 = arith.constant dense<0.000000e+00> : vector<2x128xf32>
    %171 = tpu.matmul %169, %170, %cst_31 {dimension_numbers = #tpu.dot_dimension_numbers<[1], [0], [0], [1], [0, 0, 1, 1], [], []>} : vector<2x64xf32>, vector<64x128xf32>, vector<2x128xf32> -> vector<2x128xf32>
    %c0_32 = arith.constant 0 : index
    %c0_33 = arith.constant 0 : index
    %172 = vector.load %arg11[%c0_32, %c0_33] : memref<1x128xf32, #tpu.memory_space<vmem>>, vector<1x128xf32>
    %173 = vector.broadcast %172 : vector<1x128xf32> to vector<2x128xf32>
    %174 = arith.addf %171, %173 : vector<2x128xf32>
    %c0_34 = arith.constant 0 : index
    %c0_35 = arith.constant 0 : index
    %175 = vector.load %arg12[%c0_34, %c0_35] : memref<2x128xf32, #tpu.memory_space<vmem>>, vector<2x128xf32>
    tpu.vector_store %arg12[%c0_34, %c0_35], %174 {strides = array<i32>} : memref<2x128xf32, #tpu.memory_space<vmem>>, vector<2x128xf32>,
    return
  }
  func.func @transform_0(%arg0: i32) -> (i32, i32, i32, i32) {
    %c0_i32 = arith.constant 0 : i32
    %c0_i32_0 = arith.constant 0 : i32
    %c0_i32_1 = arith.constant 0 : i32
    %c0_i32_2 = arith.constant 0 : i32
    return %arg0, %c0_i32, %c0_i32_0, %c0_i32_1 : i32, i32, i32, i32
  }
  func.func @transform_1(%arg0: i32) -> (i32, i32, i32) {
    %c0_i32 = arith.constant 0 : i32
    %c0_i32_0 = arith.constant 0 : i32
    %c0_i32_1 = arith.constant 0 : i32
    %c0_i32_2 = arith.constant 0 : i32
    return %c0_i32, %c0_i32_0, %c0_i32_1 : i32, i32, i32
  }
  func.func @transform_2(%arg0: i32) -> (i32, i32) {
    %c0_i32 = arith.constant 0 : i32
    %c0_i32_0 = arith.constant 0 : i32
    %c0_i32_1 = arith.constant 0 : i32
    return %c0_i32, %c0_i32_0 : i32, i32
  }
  func.func @transform_3(%arg0: i32) -> (i32, i32) {
    %c0_i32 = arith.constant 0 : i32
    %c0_i32_0 = arith.constant 0 : i32
    %c0_i32_1 = arith.constant 0 : i32
    return %c0_i32, %c0_i32_0 : i32, i32
  }
  func.func @transform_4(%arg0: i32) -> (i32, i32) {
    %c0_i32 = arith.constant 0 : i32
    %c0_i32_0 = arith.constant 0 : i32
    %c0_i32_1 = arith.constant 0 : i32
    return %c0_i32, %c0_i32_0 : i32, i32
  }
  func.func @transform_5(%arg0: i32) -> (i32, i32) {
    %c0_i32 = arith.constant 0 : i32
    %c0_i32_0 = arith.constant 0 : i32
    %c0_i32_1 = arith.constant 0 : i32
    return %c0_i32, %c0_i32_0 : i32, i32
  }
  func.func @transform_6(%arg0: i32) -> (i32, i32) {
    %c0_i32 = arith.constant 0 : i32
    %c0_i32_0 = arith.constant 0 : i32
    %c0_i32_1 = arith.constant 0 : i32
    return %c0_i32, %c0_i32_0 : i32, i32
  }
  func.func @transform_7(%arg0: i32) -> (i32, i32) {
    %c0_i32 = arith.constant 0 : i32
    %c0_i32_0 = arith.constant 0 : i32
    %c0_i32_1 = arith.constant 0 : i32
    return %c0_i32, %c0_i32_0 : i32, i32
  }
  func.func @transform_8(%arg0: i32) -> (i32, i32) {
    %c0_i32 = arith.constant 0 : i32
    %c0_i32_0 = arith.constant 0 : i32
    %c0_i32_1 = arith.constant 0 : i32
    return %c0_i32, %c0_i32_0 : i32, i32
  }
  func.func @transform_9(%arg0: i32) -> (i32, i32) {
    %c0_i32 = arith.constant 0 : i32
    %c0_i32_0 = arith.constant 0 : i32
    %c0_i32_1 = arith.constant 0 : i32
    return %c0_i32, %c0_i32_0 : i32, i32
  }
  func.func @transform_10(%arg0: i32) -> (i32, i32) {
    %c0_i32 = arith.constant 0 : i32
    %c0_i32_0 = arith.constant 0 : i32
    %c0_i32_1 = arith.constant 0 : i32
    return %c0_i32, %c0_i32_0 : i32, i32
  }
  func.func @transform_11(%arg0: i32) -> (i32, i32) {
    %c0_i32 = arith.constant 0 : i32
    %c0_i32_0 = arith.constant 0 : i32
    return %arg0, %c0_i32 : i32, i32
  }
}

</mosaic_0001>

<bundles_post_ra>
// kernel: net_forward.1
= control target key start
LH: loop header
LB: loop body
LE: loop exit
PB: predicated region body
PF: predicated region fallthrough
CT: control target
= control target key end

     0   :  { %v3858_v2 = vmov 0   ;;  %s5686_s0 = inlined_call_operand.vmem [shape: f32[2,8,8,1], index: 0, kind: input, shape index: {}]   ;;  %s5687_s1 = inlined_call_operand.vmem [shape: f32[3,3,64], index: 1, kind: input, shape index: {}]   ;;  %s5688_s2 = inlined_call_operand.vmem [shape: f32[1,64], index: 2, kind: input, shape index: {}]   ;;  %s5689_s3 = inlined_call_operand.vmem [shape: f32[576,64], index: 3, kind: input, shape index: {}]   ;;  %s5690_s4 = inlined_call_operand.vmem [shape: f32[1,64], index: 4, kind: input, shape index: {}]   ;;  %s5691_s5 = inlined_call_operand.vmem [shape: f32[576,128], index: 5, kind: input, shape index: {}]   ;;  %s5692_s6 = inlined_call_operand.vmem [shape: f32[1,128], index: 6, kind: input, shape index: {}]   ;;  %s5693_s7 = inlined_call_operand.vmem [shape: f32[128,64], index: 7, kind: input, shape index: {}]   ;;  %s5694_s8 = inlined_call_operand.vmem [shape: f32[1,64], index: 8, kind: input, shape index: {}]   ;;  %s5695_s9 = inlined_call_operand.vmem [shape: f32[64,128], index: 9, kind: input, shape index: {}]   ;;  %s5696_s10 = inlined_call_operand.vmem [shape: f32[1,128], index: 10, kind: input, shape index: {}]   ;;  %s5697_s11 = inlined_call_operand.hbm [shape: f32[2,128], index: 11, kind: output, shape index: {}]  }
   0x1   :  { %v41_v0 = vld [vmem:[%s5686_s0 + $0x10] sm:$0xff]  ;;  %v39_v1 = vld [vmem:[%s5686_s0] sm:$0xff]  ;;  %3825 = vset.pattern.permute.xlu1 %v3858_v2  ;;  %3824 = vset.pattern.permute.xlu0 %v3858_v2  ;;  %v42_v3 = vld [vmem:[%s5686_s0 + $0x18] sm:$0xff] }
   0x2   :  { %70 = vperm.xlu1 %3825, %v41_v0   ;;  %60 = vperm.xlu0 %3824, %v39_v1   ;;  %v40_v4 = vld [vmem:[%s5686_s0 + $0x8] sm:$0xff] }
   0x6   :  { %75 = vperm.xlu1 %3825, %v42_v3   ;;  %65 = vperm.xlu0 %3824, %v40_v4  }
   0x7   :  { %16 = vsyncpa [#allocation3], 0  ;;  %v44_v5 = vld [vmem:[%s5686_s0 + $0x28] sm:$0xff]  ;;  %v43_v6 = vld [vmem:[%s5686_s0 + $0x20] sm:$0xff]  ;;  %v5698_v13 = vmov 0.0   ;;  %vm676_vm0 = vcmask 1040384   ;;  %v118_v22 = vlaneseq }
   0x8   :  { %v48_v7 = vld [vmem:[%s5686_s0 + $0x48] sm:$0xff]  ;;  %v47_v8 = vld [vmem:[%s5686_s0 + $0x40] sm:$0xff]  ;;  %v45_v9 = vld [vmem:[%s5686_s0 + $0x30] sm:$0xff]  ;;  %v650_v14 = vrot.slane %v5698_v13, 7  ;;  %vm690_vm1 = vcmask 1046528   ;;  %s3860_s30 = smov 64  }
   0x9   :  { %v49_v10 = vld [vmem:[%s5686_s0 + $0x50] sm:$0xff]  ;;  %v51_v11 = vld [vmem:[%s5686_s0 + $0x60] sm:$0xff]  ;;  %v50_v12 = vld [vmem:[%s5686_s0 + $0x58] sm:$0xff]  ;;  %v3979_v23 = vshrl.u32 %v118_v22, 7  ;;  %vm877_vm2 = vcmask 523264   ;;  %vm3862_vm3 = vmmov 0  }
   0xa   :  { %85 = vperm.xlu1 %3825, %v44_v5   ;;  %80 = vperm.xlu0 %3824, %v43_v6   ;;  %v52_v15 = vld [vmem:[%s5686_s0 + $0x68] sm:$0xff]  ;;  %v46_v16 = vld [vmem:[%s5686_s0 + $0x38] sm:$0xff]  ;;  %v677_v17 = vsel %vm676_vm0, 0.0, %v650_v14  ;;  %v53_v19 = vld [vmem:[%s5686_s0 + $0x70] sm:$0xff]  ;;  %vm2805_vm4 = vcmask 1041409  }
   0xb   :  { %v54_v18 = vld [vmem:[%s5686_s0 + $0x78] sm:$0xff]  ;;  %v3975_v20 = vsel %vm690_vm1, %v677_v17, 0.0  ;;  %v148_v24 = vsub.s32 1, %v3979_v23  ;;  %v55_v25 = vld [vmem:[%s5687_s1] sm:$0x7]  ;;  %v212_v26 = vsub.s32 2, %v3979_v23 }
   0xc   :  { %v715_v21 = vrot.slane %v3975_v20, 1  ;;  %v3987_v27 = vsub.s32 0, %v3979_v23  ;;  %v57_v33 = vld [vmem:[%s5687_s1 + $0x8] sm:$0x7]  ;;  %v56_v35 = vld [vmem:[%s5687_s1 + $0x4] sm:$0x7] }
   0xd   :  { %v3989_v28 = vrot.slane %v55_v25, %v148_v24  ;;  %v3991_v29 = vrot.slane %v55_v25, %v212_v26  ;;  %v4005_v39 = vrot.slane %v57_v33, %v148_v24  ;;  %v4019_v48 = vrot.slane %v57_v33, %v212_v26 }
   0xe   :  { %95 = vperm.xlu1 %3825, %v48_v7   ;;  %90 = vperm.xlu0 %3824, %v47_v8   ;;  %5720 = vst [vmem:[#allocation5_spill] sm:$0xff] %v3987_v27  ;;  %v3994_v30 = vrot.slane %v55_v25, %v3987_v27  ;;  %v4010_v41 = vrot.slane %v56_v35, %v3987_v27 }
   0xf   :  { %v4016_v45 = vrot.slane %v57_v33, %v3987_v27  ;;  %v4021_v49 = vrot.slane %v56_v35, %v148_v24  ;;  %v4030_v54 = vrot.slane %v56_v35, %v212_v26 }
  0x12   :  { %276 = vperm.xlu1 %3825, %v45_v9   ;;  %100 = vperm.xlu0 %3824, %v49_v10  }
  0x16   :  { %110 = vperm.xlu1 %3825, %v51_v11   ;;  %105 = vperm.xlu0 %3824, %v50_v12  }
  0x1a   :  { %115 = vperm.xlu1 %3825, %v52_v15   ;;  %442 = vperm.xlu0 %3824, %v46_v16  }
  0x1e   :  { %447 = vperm.xlu1 %3825, %v54_v18   ;;  %281 = vperm.xlu0 %3824, %v53_v19  }
  0x22   :  { %726 = vrot.lane.b32.xlu0 %v715_v21, %s3860_s30 }
  0x7d   :  { %v71_v31 = vpop.permute.xlu1 %70  ;;  %v61_v32 = vpop.permute.xlu0 %60 }
  0x7e   :  { %v150_v34 = vmul.f32 %v3989_v28, %v61_v32  ;;  %v214_v36 = vmul.f32 %v3991_v29, %v61_v32  ;;  %v122_v37 = vmul.f32 %v3994_v30, %v61_v32  ;;  %v4013_v43 = vmul.f32 %v3989_v28, %v71_v31 }
  0x7f   :  { %v4024_v50 = vmul.f32 %v4005_v39, %v71_v31  ;;  %v4027_v51 = vmul.f32 %v3994_v30, %v71_v31  ;;  %v289_v53 = vmul.f32 %v4010_v41, %v71_v31  ;;  %v4042_v60 = vmul.f32 %v4016_v45, %v71_v31 }
  0x80   :  { %v174_v38 = vrot.slane %v150_v34, 1  ;;  %v238_v46 = vrot.slane %v214_v36, 2  ;;  %v176_v57 = vrot.slane %v4013_v43, 1  ;;  %v4049_v0 = vmul.f32 %v4019_v48, %v71_v31 }
  0x81   :  { %v4007_v40 = vpop.permute.xlu1 %75  ;;  %v66_v42 = vpop.permute.xlu0 %65  ;;  %v506_v3 = vrot.slane %v4024_v50, 1  ;;  %v4055_v4 = vmul.f32 %v4021_v49, %v71_v31  ;;  %v4059_v10 = vmul.f32 %v4030_v54, %v71_v31  ;;  %v4067_v15 = vmul.f32 %v3991_v29, %v71_v31 }
  0x82   :  { %v198_v44 = vadd.f32 %v174_v38, %v122_v37  ;;  %v151_v47 = vmul.f32 %v3989_v28, %v66_v42  ;;  %v4039_v58 = vmul.f32 %v3989_v28, %v4007_v40  ;;  %v288_v61 = vmul.f32 %v4010_v41, %v66_v42 }
  0x83   :  { %v316_v62 = vmul.f32 %v4021_v49, %v66_v42  ;;  %v123_v1 = vmul.f32 %v3994_v30, %v66_v42  ;;  %v215_v2 = vmul.f32 %v3991_v29, %v66_v42  ;;  %v380_v6 = vmul.f32 %v4030_v54, %v66_v42 }
  0x84   :  { %v262_v52 = vadd.f32 %v238_v46, %v198_v44  ;;  %v175_v59 = vrot.slane %v151_v47, 1  ;;  %v4063_v11 = vmul.f32 %v3994_v30, %v4007_v40  ;;  %v177_v12 = vrot.slane %v4039_v58, 1 }
  0x85   :  { %v4032_v55 = vpop.permute.xlu1 %85  ;;  %v4034_v56 = vpop.permute.xlu0 %80  ;;  %v340_v16 = vrot.slane %v316_v62, 1  ;;  %v570_v19 = vrot.slane %v4049_v0, 2  ;;  %v239_v21 = vrot.slane %v215_v2, 2  ;;  %v341_v25 = vrot.slane %v4055_v4, 1 }
  0x86   :  { %v155_v63 = vmul.f32 %v3989_v28, %v4032_v55  ;;  %v300_v5 = vadd.f32 %v288_v61, %v262_v52  ;;  %v199_v14 = vadd.f32 %v175_v59, %v123_v1  ;;  %v127_v17 = vmul.f32 %v3994_v30, %v4032_v55 }
  0x87   :  { %v219_v18 = vmul.f32 %v3991_v29, %v4032_v55  ;;  %v4076_v22 = vmul.f32 %v3989_v28, %v4034_v56  ;;  %v404_v31 = vrot.slane %v380_v6, 2  ;;  %v4087_v44 = vmul.f32 %v3994_v30, %v4034_v56 }
  0x88   :  { %v179_v9 = vrot.slane %v155_v63, 1  ;;  %v364_v26 = vadd.f32 %v340_v16, %v300_v5  ;;  %v263_v36 = vadd.f32 %v239_v21, %v199_v14  ;;  %v240_v50 = vrot.slane %v4067_v15, 2 }
  0x89   :  { %v96_v7 = vpop.permute.xlu1 %95  ;;  %v91_v8 = vpop.permute.xlu0 %90  ;;  %v243_v52 = vrot.slane %v219_v18, 2  ;;  %v178_v59 = vrot.slane %v4076_v22, 1  ;;  %v382_v43 = vmul.f32 %v4030_v54, %v4007_v40  ;;  %v291_v58 = vmul.f32 %v4010_v41, %v4034_v56 }
  0x8a   :  { %v156_v24 = vmul.f32 %v3989_v28, %v91_v8  ;;  %v220_v32 = vmul.f32 %v3991_v29, %v91_v8  ;;  %v203_v35 = vadd.f32 %v179_v9, %v127_v17  ;;  %v128_v37 = vmul.f32 %v3994_v30, %v91_v8 }
  0x8b   :  { %v157_v46 = vmul.f32 %v3989_v28, %v96_v7  ;;  %v221_v61 = vmul.f32 %v3991_v29, %v96_v7  ;;  %v386_v1 = vmul.f32 %v4030_v54, %v96_v7  ;;  %v301_v9 = vadd.f32 %v289_v53, %v263_v36 }
  0x8c   :  { %v180_v38 = vrot.slane %v156_v24, 1  ;;  %v244_v63 = vrot.slane %v220_v32, 2  ;;  %v267_v5 = vadd.f32 %v243_v52, %v203_v35  ;;  %v428_v14 = vadd.f32 %v404_v31, %v364_v26 }
  0x8d   :  { %v277_v33 = vpop.permute.xlu1 %276  ;;  %v4081_v34 = vpop.permute.xlu0 %100  ;;  %v405_v17 = vrot.slane %v4059_v10, 2  ;;  %v181_v18 = vrot.slane %v157_v46, 1  ;;  %v322_v21 = vmul.f32 %v4021_v49, %v96_v7  ;;  %v294_v24 = vmul.f32 %v4010_v41, %v96_v7 }
  0x8e   :  { %v321_v42 = vmul.f32 %v4021_v49, %v277_v33  ;;  %v293_v47 = vmul.f32 %v4010_v41, %v277_v33  ;;  %v204_v62 = vadd.f32 %v180_v38, %v128_v37  ;;  %v385_v8 = vmul.f32 %v4030_v54, %v277_v33 }
  0x8f   :  { %v129_v37 = vmul.f32 %v3994_v30, %v96_v7  ;;  %v245_v38 = vrot.slane %v221_v61, 2  ;;  %v455_v35 = vmul.f32 %v4016_v45, %v4007_v40  ;;  %v410_v53 = vrot.slane %v386_v1, 2 }
  0x90   :  { %v345_v6 = vrot.slane %v321_v42, 1  ;;  %v268_v16 = vadd.f32 %v244_v63, %v204_v62  ;;  %v305_v32 = vadd.f32 %v293_v47, %v267_v5  ;;  %v483_v42 = vmul.f32 %v4005_v39, %v4007_v40 }
  0x91   :  { %v4094_v2 = vpop.permute.xlu1 %110  ;;  %v4096_v4 = vpop.permute.xlu0 %105  ;;  %v409_v36 = vrot.slane %v385_v8, 2  ;;  %v466_v7 = vadd.f32 %v4042_v60, %v428_v14  ;;  %v365_v61 = vadd.f32 %v341_v25, %v301_v9  ;;  %v205_v62 = vadd.f32 %v181_v18, %v129_v37 }
  0x92   :  { %v306_v26 = vadd.f32 %v294_v24, %v268_v16  ;;  %v369_v10 = vadd.f32 %v345_v6, %v305_v32  ;;  %v346_v63 = vrot.slane %v322_v21, 1  ;;  %v4113_v5 = vmul.f32 %v4016_v45, %v277_v33 }
  0x93   :  { %v4118_v16 = vmul.f32 %v4005_v39, %v277_v33  ;;  %v4121_v6 = vmul.f32 %v4019_v48, %v277_v33  ;;  %v4125_v8 = vmul.f32 %v3989_v28, %v4081_v34  ;;  %v4129_v9 = vmul.f32 %v3989_v28, %v4096_v4 }
  0x94   :  { %v433_v60 = vadd.f32 %v409_v36, %v369_v10  ;;  %v370_v25 = vadd.f32 %v346_v63, %v306_v26  ;;  %v530_v33 = vadd.f32 %v506_v3, %v466_v7  ;;  %v429_v32 = vadd.f32 %v405_v17, %v365_v61 }
  0x95   :  { %v4107_v31 = vpop.permute.xlu1 %115  ;;  %v443_v46 = vpop.permute.xlu0 %442  ;;  %v4135_v37 = vadd.f32 %v245_v38, %v205_v62  ;;  %v510_v36 = vrot.slane %v4118_v16, 1  ;;  %v547_v3 = vmul.f32 %v4019_v48, %v4007_v40  ;;  %v4154_v17 = vmul.f32 %v3989_v28, %v4094_v2 }
  0x96   :  { %v459_v52 = vmul.f32 %v4016_v45, %v443_v46  ;;  %v487_v47 = vmul.f32 %v4005_v39, %v443_v46  ;;  %v161_v1 = vmul.f32 %v3989_v28, %v4107_v31  ;;  %v133_v14 = vmul.f32 %v3994_v30, %v4107_v31 }
  0x97   :  { %v551_v13 = vmul.f32 %v4019_v48, %v443_v46  ;;  %v4142_v26 = vmul.f32 %v3991_v29, %v4107_v31  ;;  %v4158_v38 = vmul.f32 %v3994_v30, %v4096_v4  ;;  %v183_v46 = vrot.slane %v4129_v9, 1 }
  0x98   :  { %v185_v18 = vrot.slane %v161_v1, 1  ;;  %v471_v21 = vadd.f32 %v459_v52, %v433_v60  ;;  %v511_v24 = vrot.slane %v487_v47, 1  ;;  %v4147_v52 = vmul.f32 %v3994_v30, %v4081_v34  ;;  %v4164_v47 = vld [vmem:[%s5688_s2] ss:$0 sm:$0xff] }
  0x99   :  { %v507_v7 = vrot.slane %v483_v42, 1  ;;  %v4166_v61 = vadd.f32 %v410_v53, %v370_v25  ;;  %v4168_v63 = vpop.permute.xlu0 %281  ;;  %v594_v28 = vadd.f32 %v570_v19, %v530_v33  ;;  %v467_v1 = vadd.f32 %v455_v35, %v429_v32 }
  0x9a   :  { %v4138_v10 = vadd.f32 %v185_v18, %v133_v14  ;;  %v535_v62 = vadd.f32 %v511_v24, %v471_v21  ;;  %v575_v60 = vrot.slane %v551_v13, 2  ;;  %v249_v14 = vrot.slane %v4142_v26, 2 }
  0x9b   :  { %v200_v18 = vadd.f32 %v176_v57, %v4027_v51  ;;  %v613_v42 = vadd.f32 %v4164_v47, %v594_v28  ;;  %v531_v53 = vadd.f32 %v507_v7, %v467_v1  ;;  %v571_v25 = vrot.slane %v547_v3, 2 }
  0x9c   :  { %v318_v21 = vmul.f32 %v4021_v49, %v4007_v40  ;;  %v4182_v0 = vmul.f32 %v4010_v41, %v4168_v63  ;;  %v290_v19 = vmul.f32 %v4010_v41, %v4007_v40  ;;  %v4188_v51 = vadd.f32 %v575_v60, %v535_v62 }
  0x9d   :  { %v264_v13 = vadd.f32 %v240_v50, %v200_v18  ;;  %v625_v57 = vmax.f32 %v613_v42, 0.0  ;;  %v595_v15 = vadd.f32 %v571_v25, %v531_v53  ;;  %v484_v35 = vmul.f32 %v4005_v39, %v4034_v56 }
  0x9e   :  { %v342_v33 = vrot.slane %v318_v21, 1  ;;  %v456_v32 = vmul.f32 %v4016_v45, %v4034_v56  ;;  %v548_v50 = vmul.f32 %v4019_v48, %v4034_v56  ;;  %v406_v28 = vrot.slane %v382_v43, 2 }
  0x9f   :  { %v302_v24 = vadd.f32 %v290_v19, %v264_v13  ;;  %v651_v3 = vrot.slane %v625_v57, 7  ;;  %v614_v7 = vadd.f32 %v4164_v47, %v595_v15  ;;  %v508_v1 = vrot.slane %v484_v35, 1 }
  0xa0   :  { %v572_v60 = vrot.slane %v548_v50, 2  ;;  %v201_v18 = vadd.f32 %v177_v12, %v4063_v11  ;;  %v217_v42 = vmul.f32 %v3991_v29, %v4007_v40  ;;  %v319_v21 = vmul.f32 %v4021_v49, %v4034_v56 }
  0xa1   :  { %v366_v62 = vadd.f32 %v342_v33, %v302_v24  ;;  %v678_v53 = vsel %vm676_vm0, 0.0, %v651_v3  ;;  %v626_v25 = vmax.f32 %v614_v7, 0.0  ;;  %v383_v13 = vmul.f32 %v4030_v54, %v4034_v56 }
  0xa2   :  { %v4208_v19 = vsel %vm690_vm1, %v678_v53, 0.0  ;;  %v241_v57 = vrot.slane %v217_v42, 2  ;;  %v343_v11 = vrot.slane %v319_v21, 1  ;;  %v457_v12 = vmul.f32 %v4016_v45, %v4032_v55  ;;  %v1579_v42 = vld [vmem:[%s5689_s3 + $0xf8] sm:$0xff] }
  0xa3   :  { %v430_v43 = vadd.f32 %v406_v28, %v366_v62  ;;  %783 = vrot.lane.b32.xlu0 %v4208_v19, %s3860_s30  ;;  %v652_v40 = vrot.slane %v626_v25, 7  ;;  %v485_v15 = vmul.f32 %v4005_v39, %v4032_v55  ;;  %v407_v33 = vrot.slane %v383_v13, 2  ;;  %3462 = vmatprep.subr.mxu0 %v1579_v42 }
  0xa4   :  { %v265_v24 = vadd.f32 %v241_v57, %v201_v18  ;;  %v549_v50 = vmul.f32 %v4019_v48, %v4032_v55  ;;  %v202_v28 = vadd.f32 %v178_v59, %v4087_v44  ;;  %v218_v62 = vmul.f32 %v3991_v29, %v4034_v56  ;;  %v1578_v18 = vld [vmem:[%s5689_s3 + $0xf0] sm:$0xff] }
  0xa5   :  { %v468_v35 = vadd.f32 %v456_v32, %v430_v43  ;;  %v679_v3 = vsel %vm676_vm0, 0.0, %v652_v40  ;;  %v509_v7 = vrot.slane %v485_v15, 1  ;;  %v1563_v32 = vld [vmem:[%s5689_s3 + $0x78] sm:$0xff]  ;;  %v292_v56 = vmul.f32 %v4010_v41, %v4032_v55  ;;  %v1562_v59 = vld [vmem:[%s5689_s3 + $0x70] sm:$0xff] }
  0xa6   :  { %v4236_v53 = vsel %vm690_vm1, %v679_v3, 0.0  ;;  %v303_v44 = vadd.f32 %v291_v58, %v265_v24  ;;  %v573_v25 = vrot.slane %v549_v50, 2  ;;  %v242_v21 = vrot.slane %v218_v62, 2  ;;  %3463 = vmatpush3.msra.mxu0 %v1563_v32 }
  0xa7   :  { %v532_v22 = vadd.f32 %v508_v1, %v468_v35  ;;  %785 = vrot.lane.b32.xlu1 %v4236_v53, %s3860_s30  ;;  %v320_v13 = vmul.f32 %v4021_v49, %v4032_v55  ;;  %v384_v1 = vmul.f32 %v4030_v54, %v4032_v55  ;;  %v295_v58 = vmul.f32 %v4010_v41, %v4081_v34 }
  0xa8   :  { %v367_v57 = vadd.f32 %v343_v11, %v303_v44  ;;  %v323_v40 = vmul.f32 %v4021_v49, %v4081_v34  ;;  %3464 = vmatprep.subr.mxu0 %v1578_v18  ;;  %v266_v15 = vadd.f32 %v242_v21, %v202_v28  ;;  %v574_v24 = vrot.slane %v4121_v6, 2 }
  0xa9   :  { %v596_v43 = vadd.f32 %v572_v60, %v532_v22  ;;  %v344_v35 = vrot.slane %v320_v13, 1  ;;  %v387_v50 = vmul.f32 %v4030_v54, %v4081_v34  ;;  %3465 = vmatpush3.msra.mxu0 %v1562_v59  ;;  %v307_v60 = vadd.f32 %v295_v58, %v4135_v37 }
  0xaa   :  { %v431_v3 = vadd.f32 %v407_v33, %v367_v57  ;;  %v347_v11 = vrot.slane %v323_v40, 1  ;;  %v304_v62 = vadd.f32 %v292_v56, %v266_v15  ;;  %v408_v42 = vrot.slane %v384_v1, 2 }
  0xab   :  { %v615_v55 = vadd.f32 %v4164_v47, %v596_v43  ;;  %v411_v32 = vrot.slane %v387_v50, 2  ;;  %v489_v18 = vmul.f32 %v4005_v39, %v4096_v4  ;;  %v461_v6 = vmul.f32 %v4016_v45, %v4096_v4 }
  0xac   :  { %v469_v22 = vadd.f32 %v457_v12, %v431_v3  ;;  %v371_v44 = vadd.f32 %v347_v11, %v307_v60  ;;  %v368_v21 = vadd.f32 %v344_v35, %v304_v62  ;;  %v553_v59 = vmul.f32 %v4019_v48, %v4096_v4 }
  0xad   :  { %v627_v28 = vmax.f32 %v615_v55, 0.0  ;;  %v618_v37 = vadd.f32 %v4164_v47, %v4188_v51  ;;  %v460_v33 = vmul.f32 %v4016_v45, %v4081_v34  ;;  %v513_v43 = vrot.slane %v489_v18, 1 }
  0xae   :  { %v533_v13 = vadd.f32 %v509_v7, %v469_v22  ;;  %v435_v1 = vadd.f32 %v411_v32, %v371_v44  ;;  %v432_v57 = vadd.f32 %v408_v42, %v368_v21  ;;  %v488_v40 = vmul.f32 %v4005_v39, %v4081_v34  ;;  %v1561_v32 = vld [vmem:[%s5689_s3 + $0x68] sm:$0xff] }
  0xaf   :  { %v653_v56 = vrot.slane %v627_v28, 7  ;;  %v630_v12 = vmax.f32 %v618_v37, 0.0  ;;  %v472_v58 = vadd.f32 %v460_v33, %v4166_v61  ;;  %v552_v51 = vmul.f32 %v4019_v48, %v4081_v34 }
  0xb0   :  { %v597_v35 = vadd.f32 %v573_v25, %v533_v13  ;;  %v473_v50 = vadd.f32 %v461_v6, %v435_v1  ;;  %v470_v7 = vadd.f32 %v4113_v5, %v432_v57  ;;  %v577_v3 = vrot.slane %v553_v59, 2  ;;  %v1577_v25 = vld [vmem:[%s5689_s3 + $0xe8] sm:$0xff]  ;;  %v1576_v5 = vld [vmem:[%s5689_s3 + $0xe0] sm:$0xff]  ;;  %v1574_v13 = vld [vmem:[%s5689_s3 + $0xd0] sm:$0xff] }
  0xb1   :  { %v680_v15 = vsel %vm676_vm0, 0.0, %v653_v56  ;;  %v512_v60 = vrot.slane %v488_v40, 1  ;;  %v656_v62 = vrot.slane %v630_v12, 7  ;;  %v576_v42 = vrot.slane %v552_v51, 2  ;;  %3466 = vmatprep.subr.mxu0 %v1577_v25  ;;  %v1560_v6 = vld [vmem:[%s5689_s3 + $0x60] sm:$0xff]  ;;  %v1573_v51 = vld [vmem:[%s5689_s3 + $0xc8] sm:$0xff] }
  0xb2   :  { %v4275_v55 = vsel %vm690_vm1, %v680_v15, 0.0  ;;  %v616_v61 = vadd.f32 %v4164_v47, %v597_v35  ;;  %v537_v11 = vadd.f32 %v513_v43, %v473_v50  ;;  %v534_v18 = vadd.f32 %v510_v36, %v470_v7  ;;  %3467 = vmatpush3.msra.mxu0 %v1561_v32  ;;  %v1572_v32 = vld [vmem:[%s5689_s3 + $0xc0] sm:$0xff] }
  0xb3   :  { %787 = vrot.lane.b32.xlu0 %v4275_v55, %s3860_s30  ;;  %v536_v28 = vadd.f32 %v512_v60, %v472_v58  ;;  %v207_v22 = vadd.f32 %v183_v46, %v4158_v38  ;;  %v223_v44 = vmul.f32 %v3991_v29, %v4096_v4  ;;  %v273_v21 = vadd.f32 %v249_v14, %v4138_v10  ;;  %v1575_v14 = vld [vmem:[%s5689_s3 + $0xd8] sm:$0xff]  ;;  %v1558_v58 = vld [vmem:[%s5689_s3 + $0x50] sm:$0xff] }
  0xb4   :  { %v4305_v16 = vmul.f32 %v4021_v49, %v4168_v63  ;;  %v628_v36 = vmax.f32 %v616_v61, 0.0  ;;  %v601_v59 = vadd.f32 %v577_v3, %v537_v11  ;;  %v598_v9 = vadd.f32 %v574_v24, %v534_v18  ;;  %3468 = vmatprep.subr.mxu0 %v1576_v5  ;;  %v1559_v24 = vld [vmem:[%s5689_s3 + $0x58] sm:$0xff] }
  0xb5   :  { %v600_v38 = vadd.f32 %v576_v42, %v536_v28  ;;  %v247_v46 = vrot.slane %v223_v44, 2  ;;  %v325_v37 = vmul.f32 %v4021_v49, %v4094_v2  ;;  %v683_v26 = vsel %vm676_vm0, 0.0, %v656_v62  ;;  %3469 = vmatpush3.msra.mxu0 %v1560_v6  ;;  %v1556_v44 = vld [vmem:[%s5689_s3 + $0x40] sm:$0xff] }
  0xb6   :  { %v654_v33 = vrot.slane %v628_v36, 7  ;;  %v620_v56 = vadd.f32 %v4164_v47, %v601_v59  ;;  %v389_v10 = vmul.f32 %v4030_v54, %v4094_v2  ;;  %v617_v1 = vadd.f32 %v4164_v47, %v598_v9  ;;  %3470 = vmatprep.subr.mxu0 %v1575_v14 }
  0xb7   :  { %v619_v43 = vadd.f32 %v4164_v47, %v600_v38  ;;  %v271_v57 = vadd.f32 %v247_v46, %v207_v22  ;;  %v297_v12 = vmul.f32 %v4010_v41, %v4094_v2  ;;  %v311_v40 = vadd.f32 %v4182_v0, %v273_v21  ;;  %3471 = vmatpush3.msra.mxu0 %v1559_v24  ;;  %v1557_v0 = vld [vmem:[%s5689_s3 + $0x48] sm:$0xff]  ;;  %v448_v24 = vpop.permute.xlu1 %447 }
  0xb8   :  { %v681_v15 = vsel %vm676_vm0, 0.0, %v654_v33  ;;  %v632_v35 = vmax.f32 %v620_v56, 0.0  ;;  %v349_v50 = vrot.slane %v325_v37, 1  ;;  %v629_v3 = vmax.f32 %v617_v1, 0.0  ;;  %3472 = vmatprep.subr.mxu0 %v1574_v13 }
  0xb9   :  { %v4335_v7 = vsel %vm690_vm1, %v681_v15, 0.0  ;;  %v631_v60 = vmax.f32 %v619_v43, 0.0  ;;  %v309_v61 = vadd.f32 %v297_v12, %v271_v57  ;;  %v4343_v62 = vsel %vm690_vm1, %v683_v26, 0.0  ;;  %3473 = vmatpush3.msra.mxu0 %v1558_v58 }
  0xba   :  { %789 = vrot.lane.b32.xlu1 %v4335_v7, %s3860_s30  ;;  %v658_v11 = vrot.slane %v632_v35, 7  ;;  %v413_v42 = vrot.slane %v389_v10, 2  ;;  %v491_v25 = vmul.f32 %v4005_v39, %v4107_v31  ;;  %v655_v5 = vrot.slane %v629_v3, 7  ;;  %3474 = vmatprep.subr.mxu0 %v1573_v51 }
  0xbb   :  { %v657_v18 = vrot.slane %v631_v60, 7  ;;  %v373_v28 = vadd.f32 %v349_v50, %v309_v61  ;;  %v222_v22 = vmul.f32 %v3991_v29, %v4081_v34  ;;  %v351_v6 = vrot.slane %v4305_v16, 1  ;;  %3475 = vmatpush3.msra.mxu0 %v1557_v0 }
  0xbc   :  { %v391_v21 = vmul.f32 %v4030_v54, %v4168_v63  ;;  %v463_v36 = vmul.f32 %v4016_v45, %v4107_v31  ;;  %v5721_v59 = vrot.slane %v4125_v8, 1  ;;  %v682_v34 = vsel %vm676_vm0, 0.0, %v655_v5  ;;  %3476 = vmatprep.subr.mxu0 %v1572_v32 }
  0xbd   :  { %v685_v38 = vsel %vm676_vm0, 0.0, %v658_v11  ;;  %v437_v46 = vadd.f32 %v413_v42, %v373_v28  ;;  %v555_v37 = vmul.f32 %v4019_v48, %v4107_v31  ;;  %v4368_v16 = vsel %vm690_vm1, %v682_v34, 0.0  ;;  %3477 = vmatpush3.msra.mxu0 %v1556_v44 }
  0xbe   :  { %v206_v9 = vadd.f32 %v5721_v59, %v4147_v52  ;;  %793 = vrot.lane.b32.xlu1 %v4343_v62, %s3860_s30  ;;  %v684_v33 = vsel %vm676_vm0, 0.0, %v657_v18  ;;  %v246_v8 = vrot.slane %v222_v22, 2  ;;  %v324_v52 = vmul.f32 %v4021_v49, %v4096_v4  ;;  %791 = vrot.lane.b32.xlu0 %v4368_v16, %s3860_s30 }
  0xbf   :  { %v184_v56 = vrot.slane %v4154_v17, 1  ;;  %v375_v26 = vadd.f32 %v351_v6, %v311_v40  ;;  %v475_v10 = vadd.f32 %v463_v36, %v437_v46  ;;  %v515_v14 = vrot.slane %v491_v25, 1 }
  0xc0   :  { %v4379_v13 = vsel %vm690_vm1, %v685_v38, 0.0  ;;  %v270_v1 = vadd.f32 %v246_v8, %v206_v9  ;;  %v296_v43 = vmul.f32 %v4010_v41, %v4096_v4  ;;  %v388_v57 = vmul.f32 %v4030_v54, %v4096_v4 }
  0xc1   :  { %v132_v17 = vmul.f32 %v3994_v30, %v4094_v2  ;;  %v4388_v12 = vsel %vm690_vm1, %v684_v33, 0.0  ;;  %v539_v58 = vadd.f32 %v515_v14, %v475_v10  ;;  %v579_v40 = vrot.slane %v555_v37, 2  ;;  %v1571_v33 = vld [vmem:[%s5689_s3 + $0xb8] sm:$0xff] }
  0xc2   :  { %v415_v15 = vrot.slane %v391_v21, 2  ;;  %795 = vrot.lane.b32.xlu1 %v4388_v12, %s3860_s30  ;;  %v308_v35 = vadd.f32 %v296_v43, %v270_v1  ;;  %v348_v50 = vrot.slane %v324_v52, 1  ;;  %v493_v51 = vmul.f32 %v4005_v39, %v448_v24  ;;  %797 = vrot.lane.b32.xlu0 %v4379_v13, %s3860_s30 }
  0xc3   :  { %v603_v4 = vadd.f32 %v579_v40, %v539_v58  ;;  %v208_v3 = vadd.f32 %v184_v56, %v132_v17  ;;  %v224_v30 = vmul.f32 %v3991_v29, %v4094_v2  ;;  %v412_v0 = vrot.slane %v388_v57, 2  ;;  %3478 = vmatprep.subr.mxu0 %v1571_v33  ;;  %v1554_v56 = vld [vmem:[%s5689_s3 + $0x30] sm:$0xff]  ;;  %v1595_v33 = vld [vmem:[%s5689_s3 + $0x178] sm:$0xff] }
  0xc4   :  { %v439_v60 = vadd.f32 %v415_v15, %v375_v26  ;;  %v372_v61 = vadd.f32 %v348_v50, %v308_v35  ;;  %v490_v11 = vmul.f32 %v4005_v39, %v4094_v2  ;;  %v465_v42 = vmul.f32 %v4016_v45, %v448_v24 }
  0xc5   :  { %v622_v25 = vadd.f32 %v4164_v47, %v603_v4  ;;  %v248_v32 = vrot.slane %v224_v30, 2  ;;  %v326_v5 = vmul.f32 %v4021_v49, %v4107_v31  ;;  %v557_v18 = vmul.f32 %v4019_v48, %v448_v24 }
  0xc6   :  { %v436_v28 = vadd.f32 %v412_v0, %v372_v61  ;;  %v462_v29 = vmul.f32 %v4016_v45, %v4094_v2  ;;  %v554_v22 = vmul.f32 %v4019_v48, %v4094_v2  ;;  %v298_v21 = vmul.f32 %v4010_v41, %v4107_v31  ;;  %v1555_v2 = vld [vmem:[%s5689_s3 + $0x38] sm:$0xff]  ;;  %v1570_v41 = vld [vmem:[%s5689_s3 + $0xb0] sm:$0xff] }
  0xc7   :  { %v634_v44 = vmax.f32 %v622_v25, 0.0  ;;  %v272_v6 = vadd.f32 %v248_v32, %v208_v3  ;;  %v390_v36 = vmul.f32 %v4030_v54, %v4107_v31  ;;  %v517_v59 = vrot.slane %v493_v51, 1  ;;  %3479 = vmatpush3.msra.mxu0 %v1555_v2 }
  0xc8   :  { %v474_v9 = vadd.f32 %v462_v29, %v436_v28  ;;  %v514_v49 = vrot.slane %v490_v11, 1  ;;  %v477_v34 = vadd.f32 %v465_v42, %v439_v60  ;;  %v350_v37 = vrot.slane %v326_v5, 1  ;;  %3480 = vmatprep.subr.mxu0 %v1570_v41  ;;  %v1552_v60 = vld [vmem:[%s5689_s3 + $0x20] sm:$0xff]  ;;  %v1567_v5 = vld [vmem:[%s5689_s3 + $0x98] sm:$0xff]  ;;  %v1610_v41 = vld [vmem:[%s5689_s3 + $0x1f0] sm:$0xff] }
  0xc9   :  { %v660_v38 = vrot.slane %v634_v44, 7  ;;  %v310_v46 = vadd.f32 %v298_v21, %v272_v6  ;;  %v581_v54 = vrot.slane %v557_v18, 2  ;;  %v578_v8 = vrot.slane %v554_v22, 2  ;;  %3481 = vmatpush3.msra.mxu0 %v1554_v56  ;;  %v1551_v18 = vld [vmem:[%s5689_s3 + $0x18] sm:$0xff]  ;;  %v1550_v22 = vld [vmem:[%s5689_s3 + $0x10] sm:$0xff] }
  0xca   :  { %v538_v31 = vadd.f32 %v514_v49, %v474_v9  ;;  %v541_v52 = vadd.f32 %v517_v59, %v477_v34  ;;  %v492_v26 = vmul.f32 %v4005_v39, %v4168_v63  ;;  %v414_v24 = vrot.slane %v390_v36, 2  ;;  %v1565_v59 = vld [vmem:[%s5689_s3 + $0x88] sm:$0xff]  ;;  %v1564_v49 = vld [vmem:[%s5689_s3 + $0x80] sm:$0xff] }
  0xcb   :  { %v687_v10 = vsel %vm676_vm0, 0.0, %v660_v38  ;;  %v374_v14 = vadd.f32 %v350_v37, %v310_v46  ;;  %v464_v17 = vmul.f32 %v4016_v45, %v4168_v63  ;;  %v556_v58 = vmul.f32 %v4019_v48, %v4168_v63  ;;  %v1569_v45 = vld [vmem:[%s5689_s3 + $0xa8] sm:$0xff]  ;;  %v1568_v63 = vld [vmem:[%s5689_s3 + $0xa0] sm:$0xff]  ;;  %v1611_v37 = vld [vmem:[%s5689_s3 + $0x1f8] sm:$0xff] }
  0xcc   :  { %v4428_v1 = vsel %vm690_vm1, %v687_v10, 0.0  ;;  %v602_v43 = vadd.f32 %v578_v8, %v538_v31  ;;  %v605_v57 = vadd.f32 %v581_v54, %v541_v52  ;;  %v516_v35 = vrot.slane %v492_v26, 1  ;;  %v1553_v48 = vld [vmem:[%s5689_s3 + $0x28] sm:$0xff]  ;;  %3482 = vmatprep.subr.mxu0 %v1569_v45  ;;  %v1548_v46 = vld [vmem:[%s5689_s3] sm:$0xff]  ;;  %3521 = vmatprep.subr.mxu1 %v1611_v37  ;;  %v1594_v31 = vld [vmem:[%s5689_s3 + $0x170] sm:$0xff] }
  0xcd   :  { %801 = vrot.lane.b32.xlu0 %v4428_v1, %s3860_s30  ;;  %v438_v39 = vadd.f32 %v414_v24, %v374_v14  ;;  %v5705_v50 = vrot.slane %v4275_v55, 1  ;;  %v580_v30 = vrot.slane %v556_v58, 2  ;;  %3483 = vmatpush3.msra.mxu0 %v1553_v48  ;;  %v5711_v0 = vrot.slane %v4236_v53, 1  ;;  %v1549_v9 = vld [vmem:[%s5689_s3 + $0x8] sm:$0xff]  ;;  %v1608_v14 = vld [vmem:[%s5689_s3 + $0x1e0] sm:$0xff]  ;;  %v1591_v58 = vld [vmem:[%s5689_s3 + $0x158] sm:$0xff] }
  0xce   :  { %v621_v40 = vadd.f32 %v4164_v47, %v602_v43  ;;  %v624_v15 = vadd.f32 %v4164_v47, %v605_v57  ;;  %3484 = vmatprep.subr.mxu0 %v1568_v63  ;;  %v4472_v28 = vrot.slane %v4335_v7, 2  ;;  %v5708_v44 = vrot.slane %v4208_v19, 1  ;;  %3522 = vmatpush3.msra.mxu1 %v1595_v33  ;;  %v1609_v52 = vld [vmem:[%s5689_s3 + $0x1e8] sm:$0xff]  ;;  %v1592_v43 = vld [vmem:[%s5689_s3 + $0x160] sm:$0xff] }
  0xcf   :  { %v476_v51 = vadd.f32 %v464_v17, %v438_v39  ;;  %3485 = vmatpush3.msra.mxu0 %v1552_v60  ;;  %v4497_v34 = vrot.slane %v4236_v53, 2  ;;  %v4519_v54 = vrot.slane %v4343_v62, 2  ;;  %v5703_v8 = vrot.slane %v4368_v16, 1  ;;  %3523 = vmatprep.subr.mxu1 %v1610_v41  ;;  %v1593_v26 = vld [vmem:[%s5689_s3 + $0x168] sm:$0xff]  ;;  %v1607_v17 = vld [vmem:[%s5689_s3 + $0x1d8] sm:$0xff]  ;;  %v1606_v39 = vld [vmem:[%s5689_s3 + $0x1d0] sm:$0xff] }
  0xd0   :  { %v633_v4 = vmax.f32 %v621_v40, 0.0  ;;  %3486 = vmatprep.subr.mxu0 %v1567_v5  ;;  %v636_v21 = vmax.f32 %v624_v15, 0.0  ;;  %v5722_v56 = vmov 0.0   ;;  %3524 = vmatpush3.msra.mxu1 %v1594_v31  ;;  %v5707_v40 = vrot.slane %v4379_v13, 1  ;;  %v1590_v15 = vld [vmem:[%s5689_s3 + $0x150] sm:$0xff]  ;;  %v1604_v48 = vld [vmem:[%s5689_s3 + $0x1c0] sm:$0xff] }
  0xd1   :  { %732 = vrot.lane.b32.xlu0 %v5705_v50, %s3860_s30  ;;  %v540_v3 = vadd.f32 %v516_v35, %v476_v51  ;;  %3487 = vmatpush3.msra.mxu0 %v1551_v18  ;;  %v5710_v35 = vrot.slane %v4335_v7, 1  ;;  %v1605_v51 = vld [vmem:[%s5689_s3 + $0x1c8] sm:$0xff]  ;;  %v4580_v45 = vrot.slane %v4428_v1, 2  ;;  %v1588_v63 = vld [vmem:[%s5689_s3 + $0x140] sm:$0xff]  ;;  %v1603_v60 = vld [vmem:[%s5689_s3 + $0x1b8] sm:$0xff] }
  0xd2   :  { %v659_v61 = vrot.slane %v633_v4, 7  ;;  %v662_v2 = vrot.slane %v636_v21, 7  ;;  %3525 = vmatprep.subr.mxu1 %v1609_v52  ;;  %v1589_v4 = vld [vmem:[%s5689_s3 + $0x148] sm:$0xff]  ;;  %v1599_v21 = vld [vmem:[%s5689_s3 + $0x198] sm:$0xff]  ;;  %v1596_v41 = vld [vmem:[%s5689_s3 + $0x180] sm:$0xff] }
  0xd3   :  { %v604_v11 = vadd.f32 %v580_v30, %v540_v3  ;;  %3526 = vmatpush3.msra.mxu1 %v1593_v26  ;;  %v5701_v3 = vrot.slane %v4388_v12, 1  ;;  %v760_v30 = vrot.slane %v4208_v19, 2  ;;  %v1601_v5 = vld [vmem:[%s5689_s3 + $0x1a8] sm:$0xff]  ;;  %v1580_v52 = vld [vmem:[%s5689_s3 + $0x100] sm:$0xff] }
  0xd4   :  { %v686_v42 = vsel %vm676_vm0, 0.0, %v659_v61  ;;  %v689_v10 = vsel %vm676_vm0, 0.0, %v662_v2  ;;  %3527 = vmatprep.subr.mxu1 %v1608_v14  ;;  %v1587_v61 = vld [vmem:[%s5689_s3 + $0x138] sm:$0xff]  ;;  %v1585_v18 = vld [vmem:[%s5689_s3 + $0x128] sm:$0xff]  ;;  %v5712_v14 = vrot.slane %v4388_v12, 2 }
  0xd5   :  { %v4457_v25 = vsel %vm690_vm1, %v686_v42, 0.0  ;;  %730 = vrot.lane.b32.xlu0 %v5711_v0, %s3860_s30  ;;  %v623_v32 = vadd.f32 %v4164_v47, %v604_v11  ;;  %v1566_v47 = vld [vmem:[%s5689_s3 + $0x90] sm:$0xff]  ;;  %v4546_v57 = vsel %vm690_vm1, %v689_v10, 0.0  ;;  %3528 = vmatpush3.msra.mxu1 %v1592_v43  ;;  %v4605_v42 = vrot.slane %v4379_v13, 2  ;;  %v1597_v37 = vld [vmem:[%s5689_s3 + $0x188] sm:$0xff] }
  0xd6   :  { %799 = vrot.lane.b32.xlu1 %v4457_v25, %s3860_s30  ;;  %3488 = vmatprep.subr.mxu0 %v1566_v47  ;;  %v5702_v24 = vrot.slane %v4457_v25, 1  ;;  %v1602_v11 = vld [vmem:[%s5689_s3 + $0x1b0] sm:$0xff]  ;;  %v1600_v47 = vld [vmem:[%s5689_s3 + $0x1a0] sm:$0xff]  ;;  %v1581_v33 = vld [vmem:[%s5689_s3 + $0x108] sm:$0xff]  ;;  %v4663_v2 = vrot.slane %v4457_v25, 2  ;;  %v4669_v31 = vrot.slane %v4546_v57, 2 }
  0xd7   :  { %v635_v29 = vmax.f32 %v623_v32, 0.0  ;;  %3489 = vmatpush3.msra.mxu0 %v1550_v22  ;;  %3529 = vmatprep.subr.mxu1 %v1607_v17  ;;  %v1586_v32 = vld [vmem:[%s5689_s3 + $0x130] sm:$0xff]  ;;  %v5704_v26 = vrot.slane %v4546_v57, 1  ;;  %v4680_v10 = vrot.slane %v4368_v16, 2  ;;  %v727_v17 = vpop.permute.xlu0 %726 }
  0xd8   :  { %3490 = vmatprep.subr.mxu0 %v1565_v59  ;;  %3530 = vmatpush3.msra.mxu1 %v1591_v58  ;;  %v5709_v59 = vrot.slane %v4343_v62, 1  ;;  %5723 = vst [vmem:[#allocation6_spill] sm:$0xff] %v4669_v31 }
  0xd9   :  { %841 = vrot.lane.b32.xlu0 %v4472_v28, %s3860_s30  ;;  %v661_v6 = vrot.slane %v635_v29, 7  ;;  %3491 = vmatpush3.msra.mxu0 %v1549_v9  ;;  %v4622_v29 = vrot.slane %v4275_v55, 2  ;;  %v1598_v9 = vld [vmem:[%s5689_s3 + $0x190] sm:$0xff] }
  0xda   :  { %728 = vrot.lane.b32.xlu1 %v5708_v44, %s3860_s30  ;;  %3492 = vmatprep.subr.mxu0 %v1564_v49  ;;  %v5706_v49 = vrot.slane %v4428_v1, 1 }
  0xdb   :  { %v688_v36 = vsel %vm676_vm0, 0.0, %v661_v6  ;;  %3493 = vmatpush3.msra.mxu0 %v1548_v46  ;;  %3531 = vmatprep.subr.mxu1 %v1606_v39  ;;  %v1584_v6 = vld [vmem:[%s5689_s3 + $0x120] sm:$0xff]  ;;  %v1582_v46 = vld [vmem:[%s5689_s3 + $0x110] sm:$0xff] }
  0xdc   :  { %v4500_v38 = vsel %vm690_vm1, %v688_v36, 0.0  ;;  %3702 = vmatprep.subr.mxu0 %v5722_v56  ;;  %3532 = vmatpush3.msra.mxu1 %v1590_v15  ;;  %v1583_v36 = vld [vmem:[%s5689_s3 + $0x118] sm:$0xff]  ;;  %v3861_v15 = vmov 1983009808  }
  0xdd   :  { %803 = vrot.lane.b32.xlu0 %v4500_v38, %s3860_s30  ;;  %3533 = vmatprep.subr.mxu1 %v1605_v51  ;;  %v5700_v22 = vrot.slane %v4500_v38, 1  ;;  %v4692_v43 = vrot.slane %v4500_v38, 2  ;;  %v957_v51 = vunpack.c.l.s4 %v3861_v15 }
  0xde   :  { %837 = vrot.lane.b32.xlu1 %v4497_v34, %s3860_s30  ;;  %3534 = vmatpush3.msra.mxu1 %v1589_v4 }
  0xdf   :  { %3535 = vmatprep.subr.mxu1 %v1604_v48  ;;  %5724 = vst [vmem:[#allocation7_spill] sm:$0xff] %v4692_v43  ;;  %v958_v48 = vunpack.c.0.s8 %v957_v51 }
  0xe0   :  { %3536 = vmatpush3.msra.mxu1 %v1588_v63 }
  0xe1   :  { %845 = vrot.lane.b32.xlu0 %v4519_v54, %s3860_s30  ;;  %3537 = vmatprep.subr.mxu1 %v1603_v60 }
  0xe2   :  { %736 = vrot.lane.b32.xlu1 %v5703_v8, %s3860_s30  ;;  %3538 = vmatpush3.msra.mxu1 %v1587_v61  ;;  %v4703_v61 = vsub.s32 %v958_v48, %v3979_v23  ;;  %v1038_v23 = vcombine.high %v4622_v29, %v4622_v29  ;;  %v1191_v8 = vcombine.high %v4519_v54, %v4519_v54 }
  0xe3   :  { %3539 = vmatprep.subr.mxu1 %v1602_v11  ;;  %v987_v11 = vcombine.high %v4497_v34, %v4497_v34 }
  0xe4   :  { %3540 = vmatpush3.msra.mxu1 %v1586_v32  ;;  %v994_v32 = vrot.slane %v4497_v34, %v4703_v61  ;;  %v1198_v48 = vrot.slane %v4519_v54, %v4703_v61 }
  0xe5   :  { %742 = vrot.lane.b32.xlu0 %v5702_v24, %s3860_s30  ;;  %3541 = vmatprep.subr.mxu1 %v1601_v5 }
  0xe6   :  { %805 = vrot.lane.b32.xlu1 %v4546_v57, %s3860_s30  ;;  %3542 = vmatpush3.msra.mxu1 %v1585_v18  ;;  %v1096_v18 = vrot.slane %v4472_v28, %v4703_v61 }
  0xe7   :  { %3543 = vmatprep.subr.mxu1 %v1600_v47  ;;  %v759_v47 = vrot.slane %v3975_v20, 2 }
  0xe8   :  { %3544 = vmatpush3.msra.mxu1 %v1584_v6 }
  0xe9   :  { %740 = vrot.lane.b32.xlu0 %v5707_v40, %s3860_s30  ;;  %3545 = vmatprep.subr.mxu1 %v1599_v21  ;;  %v1045_v21 = vrot.slane %v4622_v29, %v4703_v61 }
  0xea   :  { %734 = vrot.lane.b32.xlu1 %v5710_v35, %s3860_s30  ;;  %3546 = vmatpush3.msra.mxu1 %v1583_v36  ;;  %v1001_v36 = vrot.slane %v987_v11, %v4703_v61 }
  0xeb   :  { %3547 = vmatprep.subr.mxu1 %v1598_v9  ;;  %v1002_v9 = vcombine.high %v994_v32, %v994_v32  ;;  %v1053_v15 = vcombine.high %v1045_v21, %v1045_v21 }
  0xec   :  { %3548 = vmatpush3.msra.mxu1 %v1582_v46 }
  0xed   :  { %853 = vrot.lane.b32.xlu0 %v4580_v45, %s3860_s30  ;;  %3549 = vmatprep.subr.mxu1 %v1597_v37  ;;  %v1104_v37 = vcombine.high %v1096_v18, %v1096_v18  ;;  %v1663_v51 = vcombine.low %v994_v32, %v1002_v9 }
  0xee   :  { %738 = vrot.lane.b32.xlu1 %v5701_v3, %s3860_s30  ;;  %3550 = vmatpush3.msra.mxu1 %v1581_v33  ;;  %v4724_v33 = vrot.slane %v759_v47, %v4703_v61 }
  0xef   :  { %3551 = vmatprep.subr.mxu1 %v1596_v41  ;;  %v1242_v41 = vcombine.high %v759_v47, %v759_v47  ;;  %v1717_v11 = vcombine.low %v1096_v18, %v1104_v37  ;;  %v1671_v18 = vrot.slane %v1663_v51, %v4703_v61  ;;  %v1140_v37 = vcombine.high %v4680_v10, %v4680_v10 }
  0xf0   :  { %3552 = vmatpush3.msra.mxu1 %v1580_v52  ;;  %v1052_v52 = vrot.slane %v1038_v23, %v4703_v61  ;;  %v1257_v50 = vcombine.high %v4724_v33, %v4724_v33  ;;  %v4736_v23 = vsel %vm877_vm2, %v3975_v20, %v727_v17  ;;  %v1147_v20 = vrot.slane %v4680_v10, %v4703_v61 }
  0xf1   :  { %835 = vrot.lane.b32.xlu0 %v760_v30, %s3860_s30 }
  0xf2   :  { %849 = vrot.lane.b32.xlu1 %v4605_v42, %s3860_s30  ;;  %v1716_v9 = vcombine.low %v1053_v15, %v1052_v52  ;;  %v4752_v52 = vrot.slane %v1191_v8, %v4703_v61  ;;  %v1155_v8 = vcombine.high %v1147_v20, %v1147_v20 }
  0xf4   :  { %v1724_v15 = vrot.slane %v1716_v9, %v4703_v61 }
  0xf5   :  { %839 = vrot.lane.b32.xlu0 %v4622_v29, %s3860_s30 }
  0xf6   :  { %746 = vrot.lane.b32.xlu1 %v5700_v22, %s3860_s30  ;;  %v1664_v22 = vcombine.low %v1001_v36, %v1045_v21  ;;  %v1089_v21 = vcombine.high %v4472_v28, %v4472_v28  ;;  %v1206_v36 = vcombine.high %v1198_v48, %v1198_v48 }
  0xf8   :  { %v1678_v54 = vrot.slane %v1664_v22, %v4703_v61  ;;  %v1103_v22 = vrot.slane %v1089_v21, %v4703_v61  ;;  %v4756_v51 = vcombine.low %v1198_v48, %v1206_v36 }
  0xf9   :  { %871 = vrot.lane.b32.xlu0 %v5709_v59, %s3860_s30 }
  0xfa   :  { %744 = vrot.lane.b32.xlu1 %v5706_v49, %s3860_s30  ;;  %v1731_v49 = vrot.slane %v1717_v11, %v4703_v61  ;;  %5725 = vst [vmem:[#allocation8_spill] sm:$0xff] %v4756_v51  ;;  %v4758_v40 = vcombine.low %v1671_v18, %v1678_v54  ;;  %v1154_v11 = vrot.slane %v1140_v37, %v4703_v61 }
  0xfc   :  { %v4767_v0 = vcombine.low %v1724_v15, %v1731_v49  ;;  %v4796_v54 = vcombine.low %v1155_v8, %v1154_v11 }
  0xfd   :  { %851 = vrot.lane.b32.xlu0 %v4663_v2, %s3860_s30 }
  0xfe   :  { %857 = vrot.lane.b32.xlu1 %v4669_v31, %s3860_s30 }
 0x101   :  { %873 = vrot.lane.b32.xlu0 %v5704_v26, %s3860_s30  ;;  %v1256_v26 = vrot.slane %v1242_v41, %v4703_v61 }
 0x102   :  { %843 = vrot.lane.b32.xlu1 %v4680_v10, %s3860_s30 }
 0x103   :  { %v4761_v44 = vcombine.low %v1257_v50, %v1256_v26 }
 0x106   :  { %847 = vrot.lane.b32.xlu1 %v5712_v14, %s3860_s30  ;;  %v1769_v14 = vcombine.low %v1103_v22, %v1147_v20 }
 0x108   :  { %v4799_v37 = vrot.slane %v1769_v14, %v4703_v61  ;;  %v5726_v14 = vrot.slane %v4388_v12, 2 }
 0x10a   :  { %855 = vrot.lane.b32.xlu1 %v4692_v43, %s3860_s30 }
 0x115   :  { %v784_v58 = vpop.permute.xlu0 %783 }
 0x116   :  { %v889_v32 = vsel %vm877_vm2, %v759_v47, %v784_v58 }
 0x117   :  { %v952_v17 = vcombine.low %v4736_v23, %v889_v32  ;;  %v953_v9 = vcombine.high %v4736_v23, %v889_v32 }
 0x119   :  { %v786_v4 = vpop.permute.xlu1 %785  ;;  %v962_v50 = vrot.slane %v952_v17, %v4703_v61 }
 0x11a   :  { %v890_v26 = vsel %vm877_vm2, %v760_v30, %v786_v4 }
 0x11b   :  { %v1637_v17 = vrot.slane %v962_v50, %v4703_v61 }
 0x125   :  { %v4696_v39 = vpop.permute.xlu0 %787 }
 0x126   :  { %v891_v49 = vsel %vm877_vm2, %v4497_v34, %v4696_v39 }
 0x12c   :  { %v4700_v60 = vpop.permute.xlu1 %789 }
 0x130   :  { %v4698_v63 = vpop.permute.xlu0 %791  ;;  %v4714_v6 = vpop.permute.xlu1 %793 }
 0x131   :  { %v4810_v15 = vsel %vm877_vm2, %v4472_v28, %v4698_v63 }
 0x134   :  { %v4709_v5 = vpop.permute.xlu0 %797  ;;  %v796_v3 = vpop.permute.xlu1 %795 }
 0x135   :  { %v895_v48 = vsel %vm877_vm2, %v759_v47, %v796_v3  ;;  %v4816_v22 = vsel %vm877_vm2, %v5726_v14, %v4709_v5  ;;  %v5728_v5 = vrot.slane %v4335_v7, 1 }
 0x136   :  { %v1258_v4 = vcombine.low %v4736_v23, %v895_v48  ;;  %v1259_v11 = vcombine.high %v4736_v23, %v895_v48 }
 0x138   :  { %v1268_v63 = vrot.slane %v1258_v4, %v4703_v61 }
 0x13f   :  { %v4721_v46 = vpop.permute.xlu0 %801 }
 0x143   :  { %v733_v24 = vpop.permute.xlu0 %732 }
 0x144   :  { %v4773_v36 = vsel %vm877_vm2, %v4275_v55, %v733_v24  ;;  %v892_v24 = vsel %vm877_vm2, %v4622_v29, %v4700_v60  ;;  %v894_v29 = vsel %vm877_vm2, %v4680_v10, %v4714_v6  ;;  %v5727_v10 = vrot.slane %v4236_v53, 1 }
 0x145   :  { %v1105_v34 = vcombine.low %v4773_v36, %v892_v24 }
 0x147   :  { %v731_v41 = vpop.permute.xlu0 %730 }
 0x148   :  { %v4749_v58 = vpop.permute.xlu1 %799  ;;  %v4765_v59 = vsel %vm877_vm2, %v4236_v53, %v731_v41  ;;  %v969_v41 = vrot.slane %v953_v9, %v4703_v61 }
 0x149   :  { %v1055_v18 = vcombine.high %v4765_v59, %v891_v49  ;;  %v1054_v9 = vcombine.low %v4765_v59, %v891_v49 }
 0x14b   :  { %v842_v35 = vpop.permute.xlu0 %841 }
 0x14c   :  { %v729_v21 = vpop.permute.xlu1 %728  ;;  %v904_v48 = vsel %vm877_vm2, %v5728_v5, %v842_v35 }
 0x14d   :  { %v879_v32 = vsel %vm877_vm2, %v4208_v19, %v729_v21  ;;  %v1071_v21 = vrot.slane %v1055_v18, %v4703_v61  ;;  %v5729_v18 = vrot.slane %v4343_v62, 1 }
 0x14e   :  { %v1003_v47 = vcombine.low %v879_v32, %v890_v26  ;;  %v1004_v50 = vcombine.high %v879_v32, %v890_v26  ;;  %v4839_v26 = vrot.slane %v1259_v11, %v4703_v61  ;;  %v1106_v32 = vcombine.high %v4773_v36, %v892_v24 }
 0x14f   :  { %v4794_v39 = vpop.permute.xlu0 %803 }
 0x150   :  { %v1013_v60 = vrot.slane %v1003_v47, %v4703_v61  ;;  %v838_v20 = vpop.permute.xlu1 %837  ;;  %v1115_v47 = vrot.slane %v1105_v34, %v4703_v61  ;;  %v4848_v5 = vrot.slane %v1004_v50, %v4703_v61  ;;  %v4871_v50 = vsel %vm877_vm2, %v4605_v42, %v4749_v58 }
 0x151   :  { %v902_v6 = vsel %vm877_vm2, %v5727_v10, %v838_v20 }
 0x152   :  { %v1005_v8 = vcombine.low %v902_v6, %v4773_v36  ;;  %v3406_v28 = vcombine.low %v969_v41, %v1013_v60  ;;  %v1006_v53 = vcombine.high %v902_v6, %v4773_v36  ;;  %v1064_v6 = vrot.slane %v1054_v9, %v4703_v61 }
 0x153   :  { %v846_v14 = vpop.permute.xlu0 %845 }
 0x154   :  { %v4832_v20 = vrot.slane %v1005_v8, %v4703_v61  ;;  %v737_v10 = vpop.permute.xlu1 %736  ;;  %v1651_v49 = vrot.slane %v3406_v28, %v4703_v61  ;;  %v906_v4 = vsel %vm877_vm2, %v5729_v18, %v846_v14  ;;  %v3410_v28 = vcombine.low %v1071_v21, %v1115_v47 }
 0x155   :  { %v883_v35 = vsel %vm877_vm2, %v4368_v16, %v737_v10  ;;  %v1209_v34 = vcombine.low %v906_v4, %v4736_v23  ;;  %v1034_v36 = vrot.slane %v1006_v53, %v4703_v61  ;;  %v1210_v10 = vcombine.high %v906_v4, %v4736_v23 }
 0x156   :  { %v1036_v41 = vcombine.high %v1013_v60, %v4832_v20  ;;  %v1207_v8 = vcombine.low %v883_v35, %v894_v29  ;;  %v1107_v14 = vcombine.low %v904_v48, %v883_v35  ;;  %v1660_v18 = vcombine.high %v1637_v17, %v1651_v49  ;;  %v1619_v60 = vld [vmem:[%s5689_s3 + $0x238] sm:$0xff] }
 0x157   :  { %v1659_v11 = vcombine.low %v1637_v17, %v1651_v49  ;;  %v743_v30 = vpop.permute.xlu0 %742  ;;  %v1208_v24 = vcombine.high %v883_v35, %v894_v29  ;;  %v4853_v27 = vrot.slane %v1209_v34, %v4703_v61  ;;  %v4866_v29 = vrot.slane %v1268_v63, %v4703_v61  ;;  %v1618_v63 = vld [vmem:[%s5689_s3 + $0x230] sm:$0xff] }
 0x158   :  { %v806_v3 = vpop.permute.xlu1 %805  ;;  %v4859_v9 = vrot.slane %v1207_v8, %v4703_v61  ;;  %v4862_v21 = vrot.slane %v1107_v14, %v4703_v61  ;;  %2214 = vmatprep.mubr.f32.mxu0 %v1660_v18  ;;  %v3408_v17 = vcombine.low %v1036_v41, %v4848_v5  ;;  %v4876_v53 = vsel %vm877_vm2, %v4663_v2, %v4721_v46 }
 0x159   :  { %v4879_v49 = vrot.slane %v1106_v32, %v4703_v61  ;;  %2215 = vmatmul.mubr.f32.vlgmr.msra.gmra.mxu0 %v1659_v11  ;;  %v1704_v4 = vrot.slane %v1064_v6, %v4703_v61  ;;  %v1108_v34 = vcombine.high %v904_v48, %v883_v35  ;;  %v1037_v32 = vcombine.low %v4848_v5, %v1034_v36 }
 0x15a   :  { %v1138_v41 = vcombine.high %v1115_v47, %v4862_v21  ;;  %v1240_v58 = vcombine.high %v4859_v9, %v4853_v27  ;;  %v1690_v8 = vrot.slane %v3408_v17, %v4703_v61  ;;  %3703 = vmatpush3.msra.mxu0 %v1619_v60  ;;  %v4891_v14 = vrot.slane %v1208_v24, %v4703_v61  ;;  %v1617_v47 = vld [vmem:[%s5689_s3 + $0x228] sm:$0xff] }
 0x15b   :  { %v741_v46 = vpop.permute.xlu0 %740  ;;  %v4894_v18 = vrot.slane %v1210_v10, %v4703_v61  ;;  %v1743_v48 = vrot.slane %v3410_v28, %v4703_v61  ;;  %3704 = vmatprep.subr.mxu0 %v5722_v56  ;;  %v4912_v28 = vsel %vm877_vm2, %v4580_v45, %v4794_v39  ;;  %v4921_v60 = vrot.slane %v1108_v34, %v4703_v61 }
 0x15c   :  { %v735_v6 = vpop.permute.xlu1 %734  ;;  %v1713_v5 = vcombine.high %v1690_v8, %v1704_v4  ;;  %v1712_v11 = vcombine.low %v1690_v8, %v1704_v4  ;;  %3705 = vmatpush3.msra.mxu0 %v1618_v63  ;;  %v4907_v36 = vsel %vm877_vm2, %v4379_v13, %v741_v46  ;;  %v4925_v17 = vsel %vm877_vm2, %v4457_v25, %v743_v30 }
 0x15d   :  { %v4903_v35 = vsel %vm877_vm2, %v4335_v7, %v735_v6  ;;  %v3412_v7 = vcombine.low %v1138_v41, %v4879_v49  ;;  %3706 = vmatprep.subr.mxu0 %v5722_v56  ;;  %v3416_v4 = vcombine.low %v1240_v58, %v4891_v14  ;;  %v4933_v63 = vsel %vm877_vm2, %v4692_v43, %v806_v3  ;;  %v1615_v3 = vld [vmem:[%s5689_s3 + $0x218] sm:$0xff] }
 0x15e   :  { %v1156_v24 = vcombine.low %v4903_v35, %v4810_v15  ;;  %v1157_v10 = vcombine.high %v4903_v35, %v4810_v15  ;;  %2219 = vmatprep.mubr.f32.mxu0 %v1713_v5  ;;  %3707 = vmatpush3.msra.mxu0 %v1617_v47  ;;  %v1616_v15 = vld [vmem:[%s5689_s3 + $0x220] sm:$0xff]  ;;  %v1361_v30 = vcombine.high %v4907_v36, %v4871_v50 }
 0x15f   :  { %v854_v39 = vpop.permute.xlu0 %853  ;;  %2220 = vmatmul.mubr.f32.gmra.mxu0 %v1712_v11  ;;  %v1757_v8 = vrot.slane %v3412_v7, %v4703_v61  ;;  %3708 = vmatprep.subr.mxu0 %v5722_v56  ;;  %v3409_v47 = vcombine.high %v4832_v20, %v1037_v32  ;;  %v1411_v11 = vcombine.low %v4925_v17, %v4876_v53 }
 0x160   :  { %v1173_v34 = vrot.slane %v1157_v10, %v4703_v61  ;;  %v739_v41 = vpop.permute.xlu1 %738  ;;  %v1166_v46 = vrot.slane %v1156_v24, %v4703_v61  ;;  %3709 = vmatpush3.msra.mxu0 %v1616_v15  ;;  %v1139_v7 = vcombine.low %v4879_v49, %v4921_v60  ;;  %v1849_v43 = vrot.slane %v3416_v4, %v4703_v61 }
 0x161   :  { %v884_v6 = vsel %vm877_vm2, %v4388_v12, %v739_v41  ;;  %v1766_v24 = vcombine.high %v1743_v48, %v1757_v8  ;;  %v1765_v10 = vcombine.low %v1743_v48, %v1757_v8  ;;  %v1412_v41 = vcombine.high %v4925_v17, %v4876_v53  ;;  %3710 = vmatprep.subr.mxu0 %v5722_v56 }
 0x162   :  { %v1309_v5 = vcombine.low %v884_v6, %v4816_v22  ;;  %v3414_v58 = vcombine.low %v1173_v34, %v4859_v9  ;;  %v1360_v31 = vcombine.low %v4907_v36, %v4871_v50  ;;  %v1377_v48 = vrot.slane %v1361_v30, %v4703_v61  ;;  %3711 = vmatpush3.msra.mxu0 %v1615_v3  ;;  %v1614_v9 = vld [vmem:[%s5689_s3 + $0x210] sm:$0xff] }
 0x163   :  { %v836_v51 = vpop.permute.xlu0 %835  ;;  %2224 = vmatprep.mubr.f32.mxu0 %v1766_v24  ;;  %v5730_v15 = vrot.slane %v4208_v19, 1  ;;  %v5731_v4 = vrot.slane %v4379_v13, 1  ;;  %v1796_v50 = vrot.slane %v1166_v46, %v4703_v61  ;;  %v1310_v19 = vcombine.high %v884_v6, %v4816_v22  ;;  %3712 = vmatprep.subr.mxu0 %v5722_v56 }
 0x164   :  { %v850_v32 = vpop.permute.xlu1 %849  ;;  %v1319_v53 = vrot.slane %v1309_v5, %v4703_v61  ;;  %2225 = vmatmul.mubr.f32.gmra.mxu0 %v1765_v10  ;;  %v1810_v30 = vrot.slane %v3414_v58, %v4703_v61  ;;  %v5732_v24 = vrot.slane %v4428_v1, 1  ;;  %v1872_v46 = vcombine.high %v1849_v43, %v4866_v29 }
 0x165   :  { %v901_v8 = vsel %vm877_vm2, %v5730_v15, %v836_v51  ;;  %v908_v34 = vsel %vm877_vm2, %v5731_v4, %v850_v32  ;;  %v4976_v51 = vrot.slane %v1411_v11, %v4703_v61  ;;  %3713 = vmatpush3.msra.mxu0 %v1614_v9  ;;  %v1370_v6 = vrot.slane %v1360_v31, %v4703_v61 }
 0x166   :  { %v1311_v3 = vcombine.low %v908_v34, %v4925_v17  ;;  %v4982_v5 = vsel %vm877_vm2, %v5732_v24, %v854_v39  ;;  %v1819_v13 = vcombine.high %v1796_v50, %v1810_v30  ;;  %v1818_v10 = vcombine.low %v1796_v50, %v1810_v30  ;;  %3714 = vmatprep.subr.mxu0 %v5722_v56 }
 0x167   :  { %v955_v58 = vcombine.high %v901_v8, %v4765_v59  ;;  %v840_v32 = vpop.permute.xlu0 %839  ;;  %v5733_v15 = vrot.slane %v4275_v55, 1  ;;  %v3422_v4 = vcombine.low %v1377_v48, %v4976_v51  ;;  %v3418_v50 = vcombine.low %v4839_v26, %v1319_v53  ;;  %v1613_v55 = vld [vmem:[%s5689_s3 + $0x208] sm:$0xff] }
 0x168   :  { %v4988_v22 = vrot.slane %v1311_v3, %v4703_v61  ;;  %v747_v11 = vpop.permute.xlu1 %746  ;;  %v1312_v30 = vcombine.high %v908_v34, %v4925_v17  ;;  %2229 = vmatprep.mubr.f32.mxu0 %v1819_v13  ;;  %v5003_v31 = vrot.slane %v3409_v47, %v4703_v61  ;;  %v5009_v48 = vrot.slane %v1310_v19, %v4703_v61 }
 0x169   :  { %v903_v39 = vsel %vm877_vm2, %v5733_v15, %v840_v32  ;;  %v5000_v9 = vsel %vm877_vm2, %v4500_v38, %v747_v11  ;;  %v5012_v3 = vrot.slane %v1412_v41, %v4703_v61  ;;  %2230 = vmatmul.mubr.f32.gmra.mxu0 %v1818_v10  ;;  %v954_v47 = vcombine.low %v901_v8, %v4765_v59 }
 0x16a   :  { %v1342_v26 = vcombine.high %v1319_v53, %v4988_v22  ;;  %v1056_v17 = vcombine.low %v903_v39, %v4903_v35  ;;  %v1413_v34 = vcombine.low %v4982_v5, %v5000_v9  ;;  %2234 = vmatprep.mubr.f32.mxu0 %v1872_v46  ;;  %v983_v24 = vrot.slane %v955_v58, %v4703_v61  ;;  %v1612_v46 = vld [vmem:[%s5689_s3 + $0x200] sm:$0xff] }
 0x16b   :  { %v1057_v13 = vcombine.high %v903_v39, %v4903_v35  ;;  %v1871_v32 = vcombine.low %v1849_v43, %v4866_v29  ;;  %v1955_v53 = vrot.slane %v1370_v6, %v4703_v61  ;;  %v1969_v10 = vrot.slane %v3422_v4, %v4703_v61  ;;  %3715 = vmatpush3.msra.mxu0 %v1613_v55  ;;  %v872_v15 = vpop.permute.xlu0 %871 }
 0x16c   :  { %v745_v19 = vpop.permute.xlu1 %744  ;;  %v3420_v41 = vcombine.low %v1342_v26, %v5009_v48  ;;  %v5029_v59 = vrot.slane %v1312_v30, %v4703_v61  ;;  %v5032_v8 = vrot.slane %v1413_v34, %v4703_v61  ;;  %v1902_v29 = vrot.slane %v3418_v50, %v4703_v61  ;;  %3716 = vmatprep.subr.mxu0 %v5722_v56 }
 0x16d   :  { %v5036_v43 = vsel %vm877_vm2, %v4428_v1, %v745_v19  ;;  %v1513_v35 = vcombine.low %v5000_v9, %v4933_v63  ;;  %2235 = vmatmul.mubr.f32.gmra.mxu0 %v1871_v32  ;;  %v1078_v6 = vrot.slane %v1056_v17, %v4703_v61  ;;  %v1085_v39 = vrot.slane %v1057_v13, %v4703_v61 }
 0x16e   :  { %v1462_v58 = vcombine.low %v5036_v43, %v4912_v28  ;;  %v1916_v11 = vrot.slane %v3420_v41, %v4703_v61  ;;  %v1444_v1 = vcombine.high %v4976_v51, %v5032_v8  ;;  %v976_v4 = vrot.slane %v954_v47, %v4703_v61  ;;  %3717 = vmatpush3.msra.mxu0 %v1612_v46 }
 0x16f   :  { %v3407_v50 = vcombine.low %v983_v24, %v4832_v20  ;;  %v1463_v30 = vcombine.high %v5036_v43, %v4912_v28  ;;  %3745 = vmatprep.subr.mxu0 %v5722_v56  ;;  %v5734_v19 = vrot.slane %v4546_v57, 1  ;;  %v1514_v28 = vcombine.high %v5000_v9, %v4933_v63 }
 0x170   :  { %v1472_v55 = vrot.slane %v1462_v58, %v4703_v61  ;;  %v858_v26 = vpop.permute.xlu1 %857  ;;  %v1925_v17 = vcombine.high %v1902_v29, %v1916_v11  ;;  %v1924_v34 = vcombine.low %v1902_v29, %v1916_v11  ;;  %v3424_v47 = vcombine.low %v1444_v1, %v5012_v3 }
 0x171   :  { %v5058_v51 = vsel %vm877_vm2, %v5734_v19, %v858_v26  ;;  %v1644_v20 = vrot.slane %v976_v4, %v4703_v61  ;;  %v1658_v24 = vrot.slane %v3407_v50, %v4703_v61  ;;  %v1978_v32 = vcombine.high %v1955_v53, %v1969_v10  ;;  %v852_v50 = vpop.permute.xlu0 %851 }
 0x172   :  { %v1515_v13 = vcombine.low %v5058_v51, %v4736_v23  ;;  %2239 = vmatprep.mubr.f32.mxu0 %v1925_v17  ;;  %v2022_v41 = vrot.slane %v1472_v55, %v4703_v61  ;;  %v1523_v46 = vrot.slane %v1513_v35, %v4703_v61  ;;  %v913_v29 = vsel %vm877_vm2, %v4343_v62, %v872_v15 }
 0x173   :  { %2240 = vmatmul.mubr.f32.gmra.mxu0 %v1924_v34  ;;  %v2008_v58 = vrot.slane %v3424_v47, %v4703_v61  ;;  %v1662_v11 = vcombine.high %v1644_v20, %v1658_v24  ;;  %v1479_v1 = vrot.slane %v1463_v30, %v4703_v61  ;;  %v1661_v26 = vcombine.low %v1644_v20, %v1658_v24 }
 0x174   :  { %v5074_v63 = vrot.slane %v1515_v13, %v4703_v61  ;;  %v844_v4 = vpop.permute.xlu1 %843  ;;  %2244 = vmatprep.mubr.f32.mxu0 %v1978_v32  ;;  %v1711_v55 = vrot.slane %v1078_v6, %v4703_v61  ;;  %v1414_v35 = vcombine.high %v4982_v5, %v5000_v9  ;;  %v3411_v17 = vcombine.low %v1085_v39, %v4862_v21 }
 0x175   :  { %v5735_v62 = vrot.slane %v4368_v16, 1  ;;  %v1977_v34 = vcombine.low %v1955_v53, %v1969_v10  ;;  %2324 = vmatprep.mubr.f32.mxu1 %v1662_v11  ;;  %v2031_v13 = vcombine.high %v2008_v58, %v2022_v41  ;;  %v5085_v20 = vrot.slane %v1514_v28, %v4703_v61 }
 0x176   :  { %v1546_v30 = vcombine.high %v1523_v46, %v5074_v63  ;;  %2325 = vmatmul.mubr.f32.vlgmr.msra.gmra.mxu1 %v1661_v26  ;;  %v5736_v5 = vrot.slane %v4457_v25, 1  ;;  %v1715_v16 = vcombine.high %v5003_v31, %v1711_v55  ;;  %v2030_v6 = vcombine.low %v2008_v58, %v2022_v41 }
 0x177   :  { %v905_v15 = vsel %vm877_vm2, %v5735_v62, %v844_v4  ;;  %2245 = vmatmul.mubr.f32.gmra.mxu0 %v1977_v34  ;;  %v1714_v24 = vcombine.low %v5003_v31, %v1711_v55  ;;  %v3426_v32 = vcombine.low %v1479_v1, %v1523_v46  ;;  %v5737_v28 = vrot.slane %v4388_v12, 1  ;;  %v874_v55 = vpop.permute.xlu0 %873 }
 0x178   :  { %v1158_v19 = vcombine.low %v905_v15, %v913_v29  ;;  %v1159_v47 = vcombine.high %v905_v15, %v913_v29  ;;  %v5090_v9 = vsel %vm877_vm2, %v5736_v5, %v852_v50  ;;  %v848_v39 = vpop.permute.xlu1 %847  ;;  %2249 = vmatprep.mubr.f32.mxu0 %v2031_v13  ;;  %2329 = vmatprep.mubr.f32.mxu1 %v1715_v16  ;;  %v5739_v16 = vrot.slane %v4500_v38, 1 }
 0x179   :  { %v907_v29 = vsel %vm877_vm2, %v5737_v28, %v848_v39  ;;  %v3428_v25 = vcombine.low %v1546_v30, %v5085_v20  ;;  %v3413_v41 = vcombine.high %v4862_v21, %v1139_v7  ;;  %v1750_v58 = vrot.slane %v3411_v17, %v4703_v61 }
 0x17a   :  { %v1180_v53 = vrot.slane %v1158_v19, %v4703_v61  ;;  %v1187_v10 = vrot.slane %v1159_v47, %v4703_v61  ;;  %v1260_v4 = vcombine.low %v907_v29, %v4907_v36  ;;  %v1261_v31 = vcombine.high %v907_v29, %v4907_v36  ;;  %2330 = vmatmul.mubr.f32.gmra.mxu1 %v1714_v24 }
 0x17b   :  { %v1363_v12 = vcombine.high %v5090_v9, %v5036_v43  ;;  %v1343_v46 = vcombine.low %v5009_v48, %v5029_v59  ;;  %2250 = vmatmul.mubr.f32.gmra.mxu0 %v2030_v6  ;;  %v2061_v49 = vrot.slane %v3426_v32, %v4703_v61  ;;  %v2075_v21 = vrot.slane %v3428_v25, %v4703_v61 }
 0x17c   :  { %v3415_v11 = vcombine.low %v1187_v10, %v4853_v27  ;;  %v1764_v60 = vrot.slane %v3413_v41, %v4703_v61  ;;  %v1282_v7 = vrot.slane %v1260_v4, %v4703_v61  ;;  %v1289_v1 = vrot.slane %v1261_v31, %v4703_v61  ;;  %v856_v26 = vpop.permute.xlu1 %855 }
 0x17d   :  { %v1803_v36 = vrot.slane %v1180_v53, %v4703_v61  ;;  %v2084_v17 = vcombine.high %v2061_v49, %v2075_v21  ;;  %v2083_v48 = vcombine.low %v2061_v49, %v2075_v21  ;;  %v5738_v59 = vcombine.low %v4891_v14, %v4894_v18 }
 0x17e   :  { %v1817_v50 = vrot.slane %v3415_v11, %v4703_v61  ;;  %v1768_v62 = vcombine.high %v1750_v58, %v1764_v60  ;;  %v1442_v34 = vrot.slane %v1414_v35, %v4703_v61  ;;  %v1391_v30 = vrot.slane %v1363_v12, %v4703_v61 }
 0x17f   :  { %v3417_v15 = vcombine.high %v4853_v27, %v5738_v59  ;;  %v1767_v19 = vcombine.low %v1750_v58, %v1764_v60  ;;  %v1516_v47 = vcombine.high %v5058_v51, %v4736_v23  ;;  %v3419_v13 = vcombine.low %v1289_v1, %v4988_v22  ;;  %2254 = vmatprep.mubr.f32.mxu0 %v2084_v17 }
 0x180   :  { %2334 = vmatprep.mubr.f32.mxu1 %v1768_v62  ;;  %v1821_v5 = vcombine.high %v1803_v36, %v1817_v50  ;;  %v911_v6 = vsel %vm877_vm2, %v5739_v16, %v856_v26  ;;  %v914_v27 = vsel %vm877_vm2, %v4546_v57, %v874_v55  ;;  %2255 = vmatmul.mubr.f32.gmra.mxu0 %v2083_v48  ;;  %v5741_v26 = vld [vmem:[#allocation6_spill] sm:$0xff] }
 0x181   :  { %2335 = vmatmul.mubr.f32.gmra.mxu1 %v1767_v19  ;;  %v1870_v14 = vrot.slane %v1282_v7, %v4703_v61  ;;  %v1362_v18 = vcombine.low %v5090_v9, %v5036_v43  ;;  %3718 = vmatprep.mubr.msk.f32.mxu0 %vm3862_vm3, %v5722_v56  ;;  %v1856_v23 = vrot.slane %v3417_v15, %v4703_v61 }
 0x182   :  { %2339 = vmatprep.mubr.f32.mxu1 %v1821_v5  ;;  %v3421_v38 = vcombine.high %v4988_v22, %v1343_v46  ;;  %v3423_v51 = vcombine.low %v1391_v30, %v5032_v8  ;;  %v1820_v35 = vcombine.low %v1803_v36, %v1817_v50  ;;  %v1784_v57 = vrot.slane %v4796_v54, %v4703_v61 }
 0x183   :  { %v1300_v53 = vrot.slane %v4605_v42, %v4703_v61  ;;  %v1464_v10 = vcombine.low %v911_v6, %v914_v27  ;;  %v1465_v43 = vcombine.high %v911_v6, %v914_v27  ;;  %v1874_v9 = vcombine.high %v1856_v23, %v1870_v14 }
 0x184   :  { %v1909_v39 = vrot.slane %v3419_v13, %v4703_v61  ;;  %v1445_v24 = vcombine.low %v5012_v3, %v1442_v34  ;;  %3719 = vmatmul.mubr.msk.f32.vlgmr.msra.gmra.mxu0 %vm877_vm2, %v4758_v40  ;;  %v1344_v22 = vcombine.high %v4663_v2, %v4663_v2  ;;  %v5153_v54 = vrot.slane %v4663_v2, %v4703_v61 }
 0x185   :  { %2340 = vmatmul.mubr.f32.gmra.mxu1 %v1820_v35  ;;  %v1544_v32 = vrot.slane %v1516_v47, %v4703_v61  ;;  %v1384_v28 = vrot.slane %v1362_v18, %v4703_v61  ;;  %3721 = vmatprep.mubr.msk.f32.mxu0 %vm3862_vm3, %v5722_v56  ;;  %v1923_v3 = vrot.slane %v3421_v38, %v4703_v61 }
 0x186   :  { %2344 = vmatprep.mubr.f32.mxu1 %v1874_v9  ;;  %v1873_v29 = vcombine.low %v1856_v23, %v1870_v14  ;;  %v5740_v40 = vcombine.low %v4752_v52, %v4724_v33  ;;  %v1308_v41 = vcombine.high %v1300_v53, %v1300_v53  ;;  %v1293_v2 = vcombine.high %v4605_v42, %v4605_v42 }
 0x187   :  { %v1486_v58 = vrot.slane %v1464_v10, %v4703_v61  ;;  %v1493_v11 = vrot.slane %v1465_v43, %v4703_v61  ;;  %v1927_v4 = vcombine.high %v1909_v39, %v1923_v3  ;;  %v1976_v31 = vrot.slane %v3423_v51, %v4703_v61 }
 0x188   :  { %v1837_v25 = vrot.slane %v5740_v40, %v4703_v61  ;;  %3722 = vmatmul.mubr.msk.f32.gmra.mxu0 %vm877_vm2, %v4767_v0  ;;  %v1785_v12 = vcombine.low %v4799_v37, %v1784_v57  ;;  %v1358_v52 = vrot.slane %v1344_v22, %v4703_v61  ;;  %v1359_v46 = vcombine.high %v5153_v54, %v5153_v54 }
 0x189   :  { %2345 = vmatmul.mubr.f32.gmra.mxu1 %v1873_v29  ;;  %v1547_v42 = vcombine.low %v5085_v20, %v1544_v32  ;;  %3724 = vmatprep.mubr.msk.f32.mxu0 %vm3862_vm3, %v5722_v56  ;;  %v1962_v49 = vrot.slane %v1384_v28, %v4703_v61  ;;  %v3425_v21 = vcombine.high %v5032_v8, %v1445_v24  ;;  %v5742_v8 = vld [vmem:[#allocation8_spill] sm:$0xff] }
 0x18a   :  { %2349 = vmatprep.mubr.f32.mxu1 %v1927_v4  ;;  %v1926_v60 = vcombine.low %v1909_v39, %v1923_v3  ;;  %v1876_v0 = vcombine.low %v1300_v53, %v1308_v41  ;;  %v1395_v37 = vcombine.high %v4580_v45, %v4580_v45  ;;  %v1402_v7 = vrot.slane %v4580_v45, %v4703_v61  ;;  %v2985_v4 = vld [vmem:[%s5691_s5 + $0x230] sm:$0xff] }
 0x18b   :  { %v3427_v1 = vcombine.low %v1493_v11, %v5074_v63  ;;  %v1980_v36 = vcombine.high %v1962_v49, %v1976_v31  ;;  %v2029_v20 = vrot.slane %v1486_v58, %v4703_v61  ;;  %v1883_v50 = vrot.slane %v4761_v44, %v4703_v61 }
 0x18c   :  { %v1504_v55 = vrot.slane %v5741_v26, %v4703_v61  ;;  %3725 = vmatmul.mubr.msk.f32.gmra.mxu0 %vm877_vm2, %v1785_v12  ;;  %v5743_v17 = vrot.slane %v5742_v8, %v4703_v61  ;;  %v1307_v45 = vrot.slane %v1293_v2, %v4703_v61  ;;  %v2015_v48 = vrot.slane %v3425_v21, %v4703_v61  ;;  %v2946_v12 = vld [vmem:[%s5691_s5 + $0xf8] sm:$0xff]  ;;  %v2944_v21 = vld [vmem:[%s5691_s5 + $0xe8] sm:$0xff]  ;;  %v2925_v8 = vld [vmem:[%s5691_s5 + $0x50] sm:$0xff] }
 0x18d   :  { %2350 = vmatmul.mubr.f32.gmra.mxu1 %v1926_v60  ;;  %3727 = vmatprep.mubr.msk.f32.mxu0 %vm3862_vm3, %v5722_v56  ;;  %v3429_v44 = vcombine.high %v5074_v63, %v1547_v42  ;;  %v1929_v59 = vcombine.low %v1359_v46, %v1358_v52  ;;  %v1979_v15 = vcombine.low %v1962_v49, %v1976_v31  ;;  %v5744_v63 = vld [vmem:[#allocation7_spill] sm:$0xff]  ;;  %v2984_v31 = vld [vmem:[%s5691_s5 + $0x228] sm:$0xff]  ;;  %v2983_v42 = vld [vmem:[%s5691_s5 + $0x220] sm:$0xff] }
 0x18e   :  { %v1838_v62 = vcombine.low %v5743_v17, %v1837_v25  ;;  %2354 = vmatprep.mubr.f32.mxu1 %v1980_v36  ;;  %v1890_v34 = vrot.slane %v1876_v0, %v4703_v61  ;;  %v1409_v30 = vrot.slane %v1395_v37, %v4703_v61  ;;  %v1410_v19 = vcombine.high %v1402_v7, %v1402_v7  ;;  %v2930_v52 = vld [vmem:[%s5691_s5 + $0x78] sm:$0xff]  ;;  %v2945_v46 = vld [vmem:[%s5691_s5 + $0xf0] sm:$0xff]  ;;  %v2928_v0 = vld [vmem:[%s5691_s5 + $0x68] sm:$0xff] }
 0x18f   :  { %v1497_v47 = vcombine.high %v5741_v26, %v5741_v26  ;;  %v2033_v13 = vcombine.high %v2015_v48, %v2029_v20  ;;  %v2068_v5 = vrot.slane %v3427_v1, %v4703_v61  ;;  %v1928_v16 = vcombine.low %v1307_v45, %v5153_v54  ;;  %3597 = vmatprep.subr.mxu1 %v2946_v12  ;;  %v2929_v49 = vld [vmem:[%s5691_s5 + $0x70] sm:$0xff]  ;;  %v2982_v60 = vld [vmem:[%s5691_s5 + $0x218] sm:$0xff]  ;;  %v2943_v37 = vld [vmem:[%s5691_s5 + $0xe0] sm:$0xff] }
 0x190   :  { %3728 = vmatmul.mubr.msk.f32.gmra.mxu0 %vm877_vm2, %v1838_v62  ;;  %v1453_v6 = vrot.slane %v5744_v63, %v4703_v61  ;;  %v1446_v27 = vcombine.high %v5744_v63, %v5744_v63  ;;  %v1512_v14 = vcombine.high %v1504_v55, %v1504_v55  ;;  %v2082_v18 = vrot.slane %v3429_v44, %v4703_v61  ;;  %v2927_v1 = vld [vmem:[%s5691_s5 + $0x60] sm:$0xff]  ;;  %v2942_v36 = vld [vmem:[%s5691_s5 + $0xd8] sm:$0xff]  ;;  %v2941_v26 = vld [vmem:[%s5691_s5 + $0xd0] sm:$0xff] }
 0x191   :  { %2355 = vmatmul.mubr.f32.gmra.mxu1 %v1979_v15  ;;  %3730 = vmatprep.mubr.msk.f32.mxu0 %vm3862_vm3, %v5722_v56  ;;  %v1943_v23 = vrot.slane %v1929_v59, %v4703_v61  ;;  %v1891_v38 = vcombine.low %v1883_v50, %v1890_v34  ;;  %v2032_v51 = vcombine.low %v2015_v48, %v2029_v20  ;;  %v2980_v20 = vld [vmem:[%s5691_s5 + $0x208] sm:$0xff]  ;;  %v2939_v45 = vld [vmem:[%s5691_s5 + $0xc0] sm:$0xff]  ;;  %v2938_v44 = vld [vmem:[%s5691_s5 + $0xb8] sm:$0xff] }
 0x192   :  { %2359 = vmatprep.mubr.f32.mxu1 %v2033_v13  ;;  %v1981_v35 = vcombine.low %v1402_v7, %v1410_v19  ;;  %v1982_v57 = vcombine.low %v1409_v30, %v1453_v6  ;;  %v2086_v53 = vcombine.high %v2068_v5, %v2082_v18  ;;  %v1936_v10 = vrot.slane %v1928_v16, %v4703_v61  ;;  %v2981_v7 = vld [vmem:[%s5691_s5 + $0x210] sm:$0xff]  ;;  %v2940_v17 = vld [vmem:[%s5691_s5 + $0xc8] sm:$0xff]  ;;  %v2923_v48 = vld [vmem:[%s5691_s5 + $0x40] sm:$0xff] }
 0x193   :  { %v1460_v43 = vrot.slane %v1446_v27, %v4703_v61  ;;  %v1461_v9 = vcombine.high %v1453_v6, %v1453_v6  ;;  %v1511_v39 = vrot.slane %v1497_v47, %v4703_v61  ;;  %v2035_v24 = vcombine.low %v1504_v55, %v1512_v14  ;;  %3598 = vmatpush3.msra.mxu1 %v2930_v52  ;;  %v2979_v55 = vld [vmem:[%s5691_s5 + $0x200] sm:$0xff]  ;;  %v2924_v62 = vld [vmem:[%s5691_s5 + $0x48] sm:$0xff]  ;;  %v2922_v59 = vld [vmem:[%s5691_s5 + $0x38] sm:$0xff] }
 0x194   :  { %3731 = vmatmul.mubr.msk.f32.gmra.mxu0 %vm877_vm2, %v1891_v38  ;;  %v1944_v22 = vcombine.low %v1936_v10, %v1943_v23  ;;  %v2085_v54 = vcombine.low %v2068_v5, %v2082_v18  ;;  %v1989_v32 = vrot.slane %v1981_v35, %v4703_v61  ;;  %v1996_v28 = vrot.slane %v1982_v57, %v4703_v61  ;;  %v2937_v15 = vld [vmem:[%s5691_s5 + $0xb0] sm:$0xff]  ;;  %v2936_v30 = vld [vmem:[%s5691_s5 + $0xa8] sm:$0xff]  ;;  %v2935_v47 = vld [vmem:[%s5691_s5 + $0xa0] sm:$0xff] }
 0x195   :  { %2360 = vmatmul.mubr.f32.gmra.mxu1 %v2032_v51  ;;  %3733 = vmatprep.mubr.msk.f32.mxu0 %vm3862_vm3, %v5722_v56  ;;  %v2034_v3 = vcombine.low %v1461_v9, %v1460_v43  ;;  %v2049_v40 = vrot.slane %v2035_v24, %v4703_v61  ;;  %v2087_v25 = vcombine.low %v1511_v39, %v4724_v33  ;;  %v2986_v33 = vld [vmem:[%s5691_s5 + $0x238] sm:$0xff]  ;;  %v2921_v34 = vld [vmem:[%s5691_s5 + $0x30] sm:$0xff]  ;;  %v2920_v19 = vld [vmem:[%s5691_s5 + $0x28] sm:$0xff] }
 0x196   :  { %2364 = vmatprep.mubr.f32.mxu1 %v2086_v53  ;;  %v1997_v29 = vcombine.low %v1989_v32, %v1996_v28  ;;  %3746 = vmatpush3.msra.mxu0 %v2986_v33  ;;  %v2919_v13 = vld [vmem:[%s5691_s5 + $0x20] sm:$0xff]  ;;  %v2934_v5 = vld [vmem:[%s5691_s5 + $0x98] sm:$0xff]  ;;  %v2933_v63 = vld [vmem:[%s5691_s5 + $0x90] sm:$0xff] }
 0x197   :  { %v2042_v41 = vrot.slane %v2034_v3, %v4703_v61  ;;  %v2094_v58 = vrot.slane %v2087_v25, %v4703_v61  ;;  %3747 = vmatprep.subr.mxu0 %v5722_v56  ;;  %3599 = vmatprep.subr.mxu1 %v2945_v46  ;;  %v2918_v16 = vld [vmem:[%s5691_s5 + $0x18] sm:$0xff]  ;;  %v2917_v6 = vld [vmem:[%s5691_s5 + $0x10] sm:$0xff]  ;;  %v2932_v27 = vld [vmem:[%s5691_s5 + $0x88] sm:$0xff] }
 0x198   :  { %3734 = vmatmul.mubr.msk.f32.gmra.mxu0 %vm877_vm2, %v1944_v22  ;;  %3600 = vmatpush3.msra.mxu1 %v2929_v49 }
 0x199   :  { %2365 = vmatmul.mubr.f32.gmra.mxu1 %v2085_v54  ;;  %3736 = vmatprep.mubr.msk.f32.mxu0 %vm3862_vm3, %v5722_v56  ;;  %v2050_v2 = vcombine.low %v2042_v41, %v2049_v40  ;;  %v2095_v11 = vcombine.low %v2094_v58, %v1883_v50  ;;  %v2926_v50 = vld [vmem:[%s5691_s5 + $0x58] sm:$0xff]  ;;  %v5366_v41 = vld [vmem:[%s5690_s4] ss:$0 sm:$0xff]  ;;  %s3863_s4 = smov [#allocation2]  }
 0x19a   :  { %3748 = vmatpush3.msra.mxu0 %v2985_v4  ;;  %3601 = vmatprep.subr.mxu1 %v2944_v21 }
 0x19b   :  { %3749 = vmatprep.subr.mxu0 %v5722_v56  ;;  %3602 = vmatpush3.msra.mxu1 %v2928_v0 }
 0x19c   :  { %3737 = vmatmul.mubr.msk.f32.gmra.mxu0 %vm877_vm2, %v1997_v29  ;;  %3603 = vmatprep.subr.mxu1 %v2943_v37 }
 0x19d   :  { %3739 = vmatprep.mubr.msk.f32.mxu0 %vm3862_vm3, %v5722_v56  ;;  %3750 = vmatpush3.msra.mxu0 %v2984_v31 }
 0x19e   :  { %3751 = vmatprep.subr.mxu0 %v5722_v56  ;;  %3604 = vmatpush3.msra.mxu1 %v2927_v1 }
 0x19f   :  { %3752 = vmatpush3.msra.mxu0 %v2983_v42  ;;  %3605 = vmatprep.subr.mxu1 %v2942_v36 }
 0x1a0   :  { %3740 = vmatmul.mubr.msk.f32.gmra.mxu0 %vm877_vm2, %v2050_v2  ;;  %3753 = vmatprep.subr.mxu0 %v5722_v56 }
 0x1a1   :  { %3742 = vmatprep.mubr.msk.f32.mxu0 %vm3862_vm3, %v5722_v56  ;;  %3754 = vmatpush3.msra.mxu0 %v2982_v60 }
 0x1a2   :  { %3755 = vmatprep.subr.mxu0 %v5722_v56  ;;  %3606 = vmatpush3.msra.mxu1 %v2926_v50 }
 0x1a3   :  { %3756 = vmatpush3.msra.mxu0 %v2981_v7  ;;  %3607 = vmatprep.subr.mxu1 %v2941_v26 }
 0x1a4   :  { %3743 = vmatmul.mubr.msk.f32.gmra.mxu0 %vm877_vm2, %v2095_v11  ;;  %3757 = vmatprep.subr.mxu0 %v5722_v56 }
 0x1a5   :  { %3761 = vmatprep.mubr.msk.f32.mxu0 %vm3862_vm3, %v5722_v56  ;;  %3758 = vmatpush3.msra.mxu0 %v2980_v20 }
 0x1a6   :  { %3759 = vmatprep.subr.mxu0 %v5722_v56  ;;  %3608 = vmatpush3.msra.mxu1 %v2925_v8 }
 0x1a7   :  { %3760 = vmatpush3.msra.mxu0 %v2979_v55  ;;  %3609 = vmatprep.subr.mxu1 %v2940_v17 }
 0x1a8   :  { %3799 = vmatprep.subr.mxu0 %v5722_v56  ;;  %3610 = vmatpush3.msra.mxu1 %v2924_v62 }
 0x1a9   :  { %3611 = vmatprep.subr.mxu1 %v2939_v45 }
 0x1aa   :  { %3612 = vmatpush3.msra.mxu1 %v2923_v48 }
 0x1ab   :  { %3613 = vmatprep.subr.mxu1 %v2938_v44 }
 0x1ac   :  { %3614 = vmatpush3.msra.mxu1 %v2922_v59 }
 0x1ad   :  { %3615 = vmatprep.subr.mxu1 %v2937_v15 }
 0x1ae   :  { %3616 = vmatpush3.msra.mxu1 %v2921_v34 }
 0x1af   :  { %3617 = vmatprep.subr.mxu1 %v2936_v30 }
 0x1b0   :  { %3618 = vmatpush3.msra.mxu1 %v2920_v19 }
 0x1b1   :  { %3619 = vmatprep.subr.mxu1 %v2935_v47 }
 0x1b2   :  { %3620 = vmatpush3.msra.mxu1 %v2919_v13 }
 0x1b3   :  { %3621 = vmatprep.subr.mxu1 %v2934_v5 }
 0x1b4   :  { %3622 = vmatpush3.msra.mxu1 %v2918_v16 }
 0x1b5   :  { %3623 = vmatprep.subr.mxu1 %v2933_v63 }
 0x1b6   :  { %3624 = vmatpush3.msra.mxu1 %v2917_v6 }
 0x1b7   :  { %3625 = vmatprep.subr.mxu1 %v2932_v27 }
 0x219   :  { %v3494_v14 = vpop.f32.mrf.mxu0 }
 0x21b   :  { %v3495_v18 = vpop.f32.mrf.mxu0 }
 0x21c   :  { %v3496_v40 = vadd.f32 %v3495_v18, %v3494_v14 }
 0x21e   :  { %v2217_v33 = vadd.f32 %v3496_v40, %v5366_v41 }
 0x21f   :  { %v3497_v23 = vpop.f32.mrf.mxu0 }
 0x221   :  { %v3498_v38 = vpop.f32.mrf.mxu0 }
 0x222   :  { %v3499_v4 = vadd.f32 %v3498_v38, %v3497_v23 }
 0x224   :  { %v3500_v51 = vpop.f32.mrf.mxu0  ;;  %v2222_v21 = vadd.f32 %v3499_v4, %v5366_v41 }
 0x226   :  { %v3501_v35 = vpop.f32.mrf.mxu0 }
 0x227   :  { %v3502_v60 = vadd.f32 %v3501_v35, %v3500_v51 }
 0x229   :  { %v3503_v57 = vpop.f32.mrf.mxu0  ;;  %v2227_v55 = vadd.f32 %v3502_v60, %v5366_v41 }
 0x22b   :  { %v3504_v53 = vpop.f32.mrf.mxu0 }
 0x22c   :  { %v3505_v62 = vadd.f32 %v3504_v53, %v3503_v57 }
 0x22d   :  { %v3506_v10 = vpop.f32.mrf.mxu0 }
 0x22e   :  { %v2232_v27 = vadd.f32 %v3505_v62, %v5366_v41 }
 0x22f   :  { %v3507_v43 = vpop.f32.mrf.mxu0 }
 0x230   :  { %v3508_v30 = vadd.f32 %v3507_v43, %v3506_v10 }
 0x232   :  { %v2237_v53 = vadd.f32 %v3508_v30, %v5366_v41 }
 0x233   :  { %v5357_v9 = vpop.f32.mrf.mxu0 }
 0x235   :  { %v5359_v39 = vpop.f32.mrf.mxu0 }
 0x236   :  { %v3553_v24 = vpop.f32.mrf.mxu1 }
 0x237   :  { %v5361_v22 = vpop.f32.mrf.mxu0 }
 0x238   :  { %v3554_v54 = vpop.f32.mrf.mxu1 }
 0x239   :  { %v3513_v32 = vpop.f32.mrf.mxu0  ;;  %v3555_v2 = vadd.f32 %v3554_v54, %v3553_v24 }
 0x23a   :  { %v3556_v28 = vpop.f32.mrf.mxu1  ;;  %v3514_v40 = vadd.f32 %v3513_v32, %v5361_v22 }
 0x23b   :  { %v3515_v3 = vpop.f32.mrf.mxu0  ;;  %v2327_v46 = vadd.f32 %v3555_v2, %v2217_v33 }
 0x23c   :  { %v3557_v29 = vpop.f32.mrf.mxu1 }
 0x23d   :  { %v3516_v25 = vpop.f32.mrf.mxu0  ;;  %v3558_v52 = vadd.f32 %v3557_v29, %v3556_v28  ;;  %v3511_v29 = vadd.f32 %v5359_v39, %v5357_v9 }
 0x23e   :  { %v3517_v2 = vadd.f32 %v3516_v25, %v3515_v3  ;;  %v2247_v3 = vadd.f32 %v3514_v40, %v5366_v41 }
 0x23f   :  { %v2332_v20 = vadd.f32 %v3558_v52, %v2222_v21  ;;  %v2242_v32 = vadd.f32 %v3511_v29, %v5366_v41 }
 0x240   :  { %v3518_v58 = vpop.f32.mrf.mxu0  ;;  %v2252_v25 = vadd.f32 %v3517_v2, %v5366_v41 }
 0x241   :  { %v3559_v11 = vpop.f32.mrf.mxu1 }
 0x242   :  { %v3519_v31 = vpop.f32.mrf.mxu0 }
 0x243   :  { %v3560_v12 = vpop.f32.mrf.mxu1  ;;  %v3520_v33 = vadd.f32 %v3519_v31, %v3518_v58 }
 0x244   :  { %v2436_v42 = vpop.f32.mrf.mxu0  ;;  %v3561_v1 = vadd.f32 %v3560_v12, %v3559_v11 }
 0x245   :  { %v3562_v49 = vpop.f32.mrf.mxu1  ;;  %v2437_v0 = vadd.f32 %v2436_v42, %v2327_v46 }
 0x246   :  { %v3720_v37 = vpop.f32.mrf.mxu0  ;;  %v2337_v34 = vadd.f32 %v3561_v1, %v2227_v55 }
 0x247   :  { %v3563_v7 = vpop.f32.mrf.mxu1  ;;  %v2480_v36 = vmax.f32 %v2437_v0, 0.0 }
 0x248   :  { %v2441_v50 = vpop.f32.mrf.mxu0  ;;  %v3564_v19 = vadd.f32 %v3563_v7, %v3562_v49 }
 0x249   :  { %v3565_v26 = vpop.f32.mrf.mxu1  ;;  %v2498_v8 = vcombine.high %v2480_v36, %v2480_v36  ;;  %v2442_v17 = vadd.f32 %v2441_v50, %v2332_v20  ;;  %v2505_v45 = vrot.slane %v2480_v36, %v4703_v61 }
 0x24a   :  { %v3723_v48 = vpop.f32.mrf.mxu0  ;;  %v2342_v24 = vadd.f32 %v3564_v19, %v2232_v27 }
 0x24b   :  { %v3566_v44 = vpop.f32.mrf.mxu1  ;;  %v2512_v59 = vrot.slane %v2498_v8, %v4703_v61  ;;  %v2481_v15 = vmax.f32 %v2442_v17, 0.0  ;;  %v2513_v14 = vcombine.high %v2505_v45, %v2505_v45  ;;  %v2257_v48 = vadd.f32 %v3520_v33, %v5366_v41 }
 0x24c   :  { %v2446_v47 = vpop.f32.mrf.mxu0  ;;  %v3567_v57 = vadd.f32 %v3566_v44, %v3565_v26 }
 0x24d   :  { %v3568_v13 = vpop.f32.mrf.mxu1  ;;  %v2514_v5 = vcombine.high %v2512_v59, %v2512_v59  ;;  %v2515_v16 = vcombine.high %v2481_v15, %v2481_v15  ;;  %v2522_v63 = vrot.slane %v2481_v15, %v4703_v61  ;;  %v2447_v6 = vadd.f32 %v2446_v47, %v2337_v34 }
 0x24e   :  { %v3726_v18 = vpop.f32.mrf.mxu0  ;;  %v2347_v0 = vadd.f32 %v3567_v57, %v2237_v53 }
 0x24f   :  { %v3569_v23 = vpop.f32.mrf.mxu1  ;;  %v2687_v38 = vmax.f32 %v2505_v45, %v2514_v5  ;;  %v2529_v51 = vrot.slane %v2515_v16, %v4703_v61  ;;  %v2530_v35 = vcombine.high %v2522_v63, %v2522_v63  ;;  %v2688_v10 = vmax.f32 %v2513_v14, %v2522_v63  ;;  %v5745_v18 = vld [vmem:[#allocation5_spill] sm:$0xff] }
 0x250   :  { %v2482_v43 = vmax.f32 %v2447_v6, 0.0  ;;  %v2451_v54 = vpop.f32.mrf.mxu0  ;;  %v3570_v60 = vadd.f32 %v3569_v23, %v3568_v13 }
 0x251   :  { %v3571_v28 = vpop.f32.mrf.mxu1  ;;  %v2689_v11 = vmax.f32 %v2512_v59, %v2530_v35  ;;  %v2452_v52 = vadd.f32 %v2451_v54, %v2342_v24  ;;  %v3439_v49 = vrot.slane %v2687_v38, 9  ;;  %v2531_v21 = vcombine.high %v2529_v51, %v2529_v51 }
 0x252   :  { %v2532_v4 = vcombine.high %v2482_v43, %v2482_v43  ;;  %v2539_v12 = vrot.slane %v2482_v43, %v4703_v61  ;;  %v3729_v46 = vpop.f32.mrf.mxu0  ;;  %v3441_v37 = vrot.slane %v2688_v10, 9  ;;  %v2352_v45 = vadd.f32 %v3570_v60, %v2242_v32 }
 0x253   :  { %v3572_v42 = vpop.f32.mrf.mxu1  ;;  %v2483_v9 = vmax.f32 %v2452_v52, 0.0  ;;  %v5385_v8 = vmax.f32 %v2687_v38, %v3439_v49  ;;  %v3443_v19 = vrot.slane %v2689_v11, 9 }
 0x254   :  { %v2546_v7 = vrot.slane %v2532_v4, %v4703_v61  ;;  %v2547_v1 = vcombine.high %v2539_v12, %v2539_v12  ;;  %v2456_v39 = vpop.f32.mrf.mxu0  ;;  %v5389_v44 = vmax.f32 %v2688_v10, %v3441_v37  ;;  %v3573_v15 = vadd.f32 %v3572_v42, %v3571_v28 }
 0x255   :  { %v3574_v22 = vpop.f32.mrf.mxu1  ;;  %v2457_v58 = vadd.f32 %v2456_v39, %v2347_v0  ;;  %v2549_v50 = vcombine.high %v2483_v9, %v2483_v9  ;;  %v2556_v17 = vrot.slane %v2483_v9, %v4703_v61  ;;  %v2800_v41 = vrot.slane %v5385_v8, %v5745_v18 }
 0x256   :  { %v2548_v31 = vcombine.high %v2546_v7, %v2546_v7  ;;  %v2723_v36 = vmax.f32 %v2529_v51, %v2547_v1  ;;  %v2724_v20 = vmax.f32 %v2531_v21, %v2546_v7  ;;  %v3732_v26 = vpop.f32.mrf.mxu0  ;;  %v2357_v43 = vadd.f32 %v3573_v15, %v2247_v3 }
 0x257   :  { %v3575_v55 = vpop.f32.mrf.mxu1  ;;  %v2484_v62 = vmax.f32 %v2457_v58, 0.0  ;;  %v2563_v59 = vrot.slane %v2549_v50, %v4703_v61  ;;  %v2564_v6 = vcombine.high %v2556_v17, %v2556_v17  ;;  %v5396_v54 = vmax.f32 %v2689_v11, %v3443_v19 }
 0x258   :  { %v2461_v34 = vpop.f32.mrf.mxu0  ;;  %v2725_v16 = vmax.f32 %v2539_v12, %v2548_v31  ;;  %v3445_v63 = vrot.slane %v2723_v36, 9  ;;  %v3447_v23 = vrot.slane %v2724_v20, 9  ;;  %v3576_v53 = vadd.f32 %v3575_v55, %v3574_v22 }
 0x259   :  { %v3577_v30 = vpop.f32.mrf.mxu1  ;;  %v2566_v47 = vcombine.high %v2484_v62, %v2484_v62  ;;  %v2573_v13 = vrot.slane %v2484_v62, %v4703_v61  ;;  %v2462_v5 = vadd.f32 %v2461_v34, %v2352_v45  ;;  %v2565_v27 = vcombine.high %v2563_v59, %v2563_v59 }
 0x25a   :  { %v3735_v14 = vpop.f32.mrf.mxu0  ;;  %v2813_v28 = vrot.slane %v5389_v44, %v5745_v18  ;;  %v5400_v2 = vmax.f32 %v2723_v36, %v3445_v63  ;;  %v3449_v33 = vrot.slane %v2725_v16, 9  ;;  %v5403_v46 = vmax.f32 %v2724_v20, %v3447_v23 }
 0x25b   :  { %v2580_v38 = vrot.slane %v2566_v47, %v4703_v61  ;;  %v2485_v51 = vmax.f32 %v2462_v5, 0.0  ;;  %v2759_v35 = vmax.f32 %v2556_v17, %v2565_v27  ;;  %v2760_v57 = vmax.f32 %v2564_v6, %v2573_v13  ;;  %v3578_v10 = vpop.f32.mrf.mxu1 }
 0x25c   :  { %v2466_v24 = vpop.f32.mrf.mxu0  ;;  %v2581_v29 = vcombine.high %v2573_v13, %v2573_v13  ;;  %v3579_v21 = vadd.f32 %v3578_v10, %v3577_v30  ;;  %v2362_v37 = vadd.f32 %v3576_v53, %v2252_v25  ;;  %v5406_v32 = vmax.f32 %v2725_v16, %v3449_v33  ;;  %v2931_v53 = vld [vmem:[%s5691_s5 + $0x80] sm:$0xff]  ;;  %v2978_v33 = vld [vmem:[%s5691_s5 + $0x1f8] sm:$0xff] }
 0x25d   :  { %v2583_v40 = vcombine.high %v2485_v51, %v2485_v51  ;;  %v2590_v4 = vrot.slane %v2485_v51, %v4703_v61  ;;  %v2467_v12 = vadd.f32 %v2466_v24, %v2357_v43  ;;  %v2582_v42 = vcombine.high %v2580_v38, %v2580_v38  ;;  %v2915_v10 = vld [vmem:[%s5691_s5] sm:$0xff] }
 0x25e   :  { %v3738_v52 = vpop.f32.mrf.mxu0  ;;  %v3453_v11 = vrot.slane %v2760_v57, 9  ;;  %v3451_v1 = vrot.slane %v2759_v35, 9  ;;  %v2761_v9 = vmax.f32 %v2563_v59, %v2581_v29  ;;  %v2367_v55 = vadd.f32 %v3579_v21, %v2257_v48 }
 0x25f   :  { %v2597_v49 = vrot.slane %v2583_v40, %v4703_v61  ;;  %v2598_v60 = vcombine.high %v2590_v4, %v2590_v4  ;;  %v2486_v0 = vmax.f32 %v2467_v12, 0.0  ;;  %v2839_v40 = vrot.slane %v5400_v2, %v5745_v18 }
 0x260   :  { %v2471_v7 = vpop.f32.mrf.mxu0  ;;  %v5409_v17 = vmax.f32 %v2760_v57, %v3453_v11  ;;  %v5412_v15 = vmax.f32 %v2759_v35, %v3451_v1  ;;  %v3455_v34 = vrot.slane %v2761_v9, 9  ;;  %v2916_v57 = vld [vmem:[%s5691_s5 + $0x8] sm:$0xff] }
 0x261   :  { %v2599_v39 = vcombine.high %v2597_v49, %v2597_v49  ;;  %v2691_v22 = vmax.f32 %v2582_v42, %v2597_v49  ;;  %v2690_v3 = vmax.f32 %v2580_v38, %v2598_v60  ;;  %v2600_v58 = vcombine.high %v2486_v0, %v2486_v0  ;;  %3626 = vmatpush3.msra.mxu1 %v2916_v57 }
 0x262   :  { %v2472_v31 = vadd.f32 %v2471_v7, %v2362_v37  ;;  %v3741_v36 = vpop.f32.mrf.mxu0  ;;  %v2607_v26 = vrot.slane %v2486_v0, %v4703_v61  ;;  %3627 = vmatprep.subr.mxu1 %v2931_v53  ;;  %v2827_v7 = vrot.slane %v5396_v54, %v5745_v18  ;;  %v2976_v53 = vld [vmem:[%s5691_s5 + $0x1e8] sm:$0xff] }
 0x263   :  { %v2692_v20 = vmax.f32 %v2590_v4, %v2599_v39  ;;  %v3442_v50 = vrot.slane %v2691_v22, 9  ;;  %v3440_v62 = vrot.slane %v2690_v3, 9  ;;  %v2614_v25 = vrot.slane %v2600_v58, %v4703_v61  ;;  %3628 = vmatpush3.msra.mxu1 %v2915_v10  ;;  %v2960_v10 = vld [vmem:[%s5691_s5 + $0x168] sm:$0xff] }
 0x264   :  { %v2487_v45 = vmax.f32 %v2472_v31, 0.0  ;;  %v2476_v59 = vpop.f32.mrf.mxu0  ;;  %v2615_v27 = vcombine.high %v2607_v26, %v2607_v26  ;;  %3632 = vmatprep.subr.mxu1 %v2978_v33  ;;  %v2958_v33 = vld [vmem:[%s5691_s5 + $0x158] sm:$0xff] }
 0x265   :  { %v3444_v30 = vrot.slane %v2692_v20, 9  ;;  %v2477_v19 = vadd.f32 %v2476_v59, %v2367_v55  ;;  %v2702_v47 = vmax.f32 %v2690_v3, %v3440_v62  ;;  %v2616_v13 = vcombine.high %v2614_v25, %v2614_v25 }
 0x266   :  { %v2617_v5 = vcombine.high %v2487_v45, %v2487_v45  ;;  %v2624_v16 = vrot.slane %v2487_v45, %v4703_v61  ;;  %v3744_v63 = vpop.f32.mrf.mxu0  ;;  %v2712_v6 = vmax.f32 %v2691_v22, %v3442_v50  ;;  %v2793_v22 = vmax.f32 %v2761_v9, %v3455_v34 }
 0x267   :  { %v2722_v48 = vmax.f32 %v2692_v20, %v3444_v30  ;;  %v2488_v14 = vmax.f32 %v2477_v19, 0.0  ;;  %v2804_v23 = vrot.slane %v2702_v47, %v5745_v18  ;;  %v2726_v38 = vmax.f32 %v2607_v26, %v2616_v13 }
 0x268   :  { %v2631_v51 = vrot.slane %v2617_v5, %v4703_v61  ;;  %v2632_v35 = vcombine.high %v2624_v16, %v2624_v16  ;;  %v2727_v43 = vmax.f32 %v2615_v27, %v2624_v16  ;;  %v2817_v37 = vrot.slane %v2712_v6, %v5745_v18 }
 0x269   :  { %v2634_v24 = vcombine.high %v2488_v14, %v2488_v14  ;;  %v2641_v29 = vrot.slane %v2488_v14, %v4703_v61  ;;  %v3446_v4 = vrot.slane %v2726_v38, 9  ;;  %v2806_v42 = vsel %vm2805_vm4, %v2804_v23, %v2800_v41  ;;  %v2962_v23 = vld [vmem:[%s5691_s5 + $0x178] sm:$0xff] }
 0x26a   :  { %v2633_v12 = vcombine.high %v2631_v51, %v2631_v51  ;;  %v2728_v52 = vmax.f32 %v2614_v25, %v2632_v35  ;;  %v3448_v49 = vrot.slane %v2727_v43, 9  ;;  %v2831_v2 = vrot.slane %v2722_v48, %v5745_v18  ;;  %v2961_v35 = vld [vmem:[%s5691_s5 + $0x170] sm:$0xff] }
 0x26b   :  { %v2648_v21 = vrot.slane %v2634_v24, %v4703_v61  ;;  %v2649_v11 = vcombine.high %v2641_v29, %v2641_v29  ;;  %v2738_v60 = vmax.f32 %v2726_v38, %v3446_v4  ;;  %v2818_v54 = vsel %vm2805_vm4, %v2817_v37, %v2813_v28  ;;  %v2977_v38 = vld [vmem:[%s5691_s5 + $0x1f0] sm:$0xff]  ;;  %v2968_v37 = vld [vmem:[%s5691_s5 + $0x1a8] sm:$0xff] }
 0x26c   :  { %v3450_v0 = vrot.slane %v2728_v52, 9  ;;  %v2748_v1 = vmax.f32 %v2727_v43, %v3448_v49  ;;  %v2832_v58 = vsel %vm2805_vm4, %v2831_v2, %v2827_v7  ;;  %v2853_v9 = vrot.slane %v5403_v46, %v5745_v18  ;;  %v2975_v43 = vld [vmem:[%s5691_s5 + $0x1e0] sm:$0xff]  ;;  %v2973_v4 = vld [vmem:[%s5691_s5 + $0x1d0] sm:$0xff]  ;;  %v2954_v2 = vld [vmem:[%s5691_s5 + $0x138] sm:$0xff] }
 0x26d   :  { %v2650_v8 = vcombine.high %v2648_v21, %v2648_v21  ;;  %v2762_v39 = vmax.f32 %v2631_v51, %v2649_v11  ;;  %v2763_v41 = vmax.f32 %v2633_v12, %v2648_v21  ;;  %v2843_v3 = vrot.slane %v2738_v60, %v5745_v18  ;;  %v2957_v12 = vld [vmem:[%s5691_s5 + $0x150] sm:$0xff]  ;;  %v2971_v49 = vld [vmem:[%s5691_s5 + $0x1c0] sm:$0xff]  ;;  %v2970_v11 = vld [vmem:[%s5691_s5 + $0x1b8] sm:$0xff] }
 0x26e   :  { %v2758_v61 = vmax.f32 %v2728_v52, %v3450_v0  ;;  %v2857_v31 = vrot.slane %v2748_v1, %v5745_v18  ;;  %v2865_v34 = vrot.slane %v5406_v32, %v5745_v18  ;;  %v2891_v30 = vrot.slane %v5409_v17, %v5745_v18  ;;  %v2972_v52 = vld [vmem:[%s5691_s5 + $0x1c8] sm:$0xff]  ;;  %v2955_v21 = vld [vmem:[%s5691_s5 + $0x140] sm:$0xff]  ;;  %v2969_v60 = vld [vmem:[%s5691_s5 + $0x1b0] sm:$0xff] }
 0x26f   :  { %v2764_v36 = vmax.f32 %v2641_v29, %v2650_v8  ;;  %v3452_v20 = vrot.slane %v2762_v39, 9  ;;  %v3454_v50 = vrot.slane %v2763_v41, 9  ;;  %v2844_v26 = vsel %vm2805_vm4, %v2843_v3, %v2839_v40  ;;  %v2959_v29 = vld [vmem:[%s5691_s5 + $0x160] sm:$0xff]  ;;  %v2974_v40 = vld [vmem:[%s5691_s5 + $0x1d8] sm:$0xff]  ;;  %v2953_v0 = vld [vmem:[%s5691_s5 + $0x130] sm:$0xff] }
 0x270   :  { %v2869_v55 = vrot.slane %v2758_v61, %v5745_v18  ;;  %v3826_v59 = vpack.i.bf16 %v2818_v54, %v2844_v26  ;;  %v5457_v44 = vsel %vm2805_vm4, %v2857_v31, %v2853_v9  ;;  %v2879_v46 = vrot.slane %v5412_v15, %v5745_v18  ;;  %v2952_v7 = vld [vmem:[%s5691_s5 + $0x128] sm:$0xff]  ;;  %v2967_v1 = vld [vmem:[%s5691_s5 + $0x1a0] sm:$0xff]  ;;  %v2949_v3 = vld [vmem:[%s5691_s5 + $0x110] sm:$0xff] }
 0x271   :  { %v2774_v62 = vmax.f32 %v2762_v39, %v3452_v20  ;;  %v2784_v25 = vmax.f32 %v2763_v41, %v3454_v50  ;;  %v3456_v45 = vrot.slane %v2764_v36, 9  ;;  %v2905_v13 = vrot.slane %v2793_v22, %v5745_v18  ;;  %v2951_v8 = vld [vmem:[%s5691_s5 + $0x120] sm:$0xff]  ;;  %v2966_v39 = vld [vmem:[%s5691_s5 + $0x198] sm:$0xff]  ;;  %v2965_v22 = vld [vmem:[%s5691_s5 + $0x190] sm:$0xff] }
 0x272   :  { %3827 = vrot.lane.b32.xlu1 %v3826_v59, %s3860_s30  ;;  %v2870_v5 = vsel %vm2805_vm4, %v2869_v55, %v2865_v34  ;;  %v2950_v41 = vld [vmem:[%s5691_s5 + $0x118] sm:$0xff]  ;;  %v2964_v61 = vld [vmem:[%s5691_s5 + $0x188] sm:$0xff]  ;;  %v2947_v20 = vld [vmem:[%s5691_s5 + $0x100] sm:$0xff] }
 0x273   :  { %v2794_v28 = vmax.f32 %v2764_v36, %v3456_v45  ;;  %v2895_v19 = vrot.slane %v2784_v25, %v5745_v18  ;;  %v2883_v47 = vrot.slane %v2774_v62, %v5745_v18  ;;  %v2963_v36 = vld [vmem:[%s5691_s5 + $0x180] sm:$0xff]  ;;  %v3222_v54 = vld [vmem:[%s5693_s7 + $0x78] sm:$0xff]  ;;  %v3221_v26 = vld [vmem:[%s5693_s7 + $0x70] sm:$0xff] }
 0x274   :  { %v3220_v55 = vld [vmem:[%s5693_s7 + $0x68] sm:$0xff]  ;;  %v3219_v9 = vld [vmem:[%s5693_s7 + $0x60] sm:$0xff]  ;;  %v3218_v62 = vld [vmem:[%s5693_s7 + $0x58] sm:$0xff] }
 0x275   :  { %v2909_v32 = vrot.slane %v2794_v28, %v5745_v18  ;;  %v2896_v17 = vsel %vm2805_vm4, %v2895_v19, %v2891_v30  ;;  %v2884_v16 = vsel %vm2805_vm4, %v2883_v47, %v2879_v46  ;;  %v3217_v25 = vld [vmem:[%s5693_s7 + $0x50] sm:$0xff]  ;;  %v3216_v59 = vld [vmem:[%s5693_s7 + $0x48] sm:$0xff]  ;;  %v3215_v30 = vld [vmem:[%s5693_s7 + $0x40] sm:$0xff] }
 0x276   :  { %v3831_v63 = vpack.i.bf16 %v2870_v5, %v2896_v17  ;;  %v3213_v28 = vld [vmem:[%s5693_s7 + $0x30] sm:$0xff]  ;;  %v3212_v19 = vld [vmem:[%s5693_s7 + $0x28] sm:$0xff]  ;;  %v3211_v46 = vld [vmem:[%s5693_s7 + $0x20] sm:$0xff] }
 0x277   :  { %v2910_v6 = vsel %vm2805_vm4, %v2909_v32, %v2905_v13  ;;  %v3210_v47 = vld [vmem:[%s5693_s7 + $0x18] sm:$0xff]  ;;  %v3209_v13 = vld [vmem:[%s5693_s7 + $0x10] sm:$0xff]  ;;  %v3208_v17 = vld [vmem:[%s5693_s7 + $0x8] sm:$0xff] }
 0x278   :  { %3762 = vmatmul.mubr.msk.f32.vlgmr.msra.gmra.mxu0 %vm877_vm2, %v2910_v6  ;;  %3832 = vrot.lane.b32.xlu0 %v3831_v63, %s3860_s30  ;;  %v3308_v32 = vld [vmem:[%s5695_s9 + $0x38] sm:$0xff]  ;;  %v3307_v5 = vld [vmem:[%s5695_s9 + $0x30] sm:$0xff]  ;;  %v3207_v63 = vld [vmem:[%s5693_s7] sm:$0xff] }
 0x279   :  { %3815 = vmatprep.mubr.msk.f32.mxu0 %vm3862_vm3, %v5722_v56  ;;  %3800 = vmatpush3.msra.mxu0 %v3308_v32  ;;  %v3305_v6 = vld [vmem:[%s5695_s9 + $0x20] sm:$0xff] }
 0x27a   :  { %3801 = vmatprep.subr.mxu0 %v5722_v56 }
 0x27b   :  { %3802 = vmatpush3.msra.mxu0 %v3307_v5 }
 0x27c   :  { %3803 = vmatprep.subr.mxu0 %v5722_v56 }
 0x2e4   :  { %v3828_v15 = vpop.permute.xlu1 %3827 }
 0x2e5   :  { %v3830_v48 = vunpack.i.h.bf16 %v3828_v15  ;;  %v3829_v27 = vunpack.i.l.bf16 %v3828_v15  ;;  %v3304_v15 = vld [vmem:[%s5695_s9 + $0x18] sm:$0xff] }
 0x2e7   :  { %v2911_v18 = vsel %vm877_vm2, %v2806_v42, %v3830_v48  ;;  %v2912_v14 = vsel %vm877_vm2, %v2832_v58, %v3829_v27  ;;  %v2956_v42 = vld [vmem:[%s5691_s5 + $0x148] sm:$0xff] }
 0x2e8   :  { %3060 = vmatprep.mubr.f32.mxu1 %v2912_v14  ;;  %v2948_v58 = vld [vmem:[%s5691_s5 + $0x108] sm:$0xff]  ;;  %v3457_v14 = vld [vmem:[%s5692_s6] ss:$0 sm:$0xff] }
 0x2e9   :  { %3061 = vmatmul.mubr.f32.vlgmr.msra.gmra.mxu1 %v2911_v18 }
 0x2ea   :  { %v5482_v51 = vpop.permute.xlu0 %3832  ;;  %3633 = vmatpush3.msra.mxu1 %v2962_v23 }
 0x2eb   :  { %v3834_v57 = vunpack.i.l.bf16 %v5482_v51  ;;  %3634 = vmatprep.subr.mxu1 %v2977_v38  ;;  %v3835_v31 = vunpack.i.h.bf16 %v5482_v51 }
 0x2ec   :  { %3635 = vmatpush3.msra.mxu1 %v2961_v35 }
 0x2ed   :  { %v2914_v24 = vsel %vm877_vm2, %v2884_v16, %v3834_v57  ;;  %3636 = vmatprep.subr.mxu1 %v2976_v53  ;;  %v2913_v50 = vsel %vm877_vm2, %v5457_v44, %v3835_v31  ;;  %v3214_v44 = vld [vmem:[%s5693_s7 + $0x38] sm:$0xff]  ;;  %v3306_v16 = vld [vmem:[%s5695_s9 + $0x28] sm:$0xff] }
 0x2ee   :  { %3130 = vmatprep.mubr.f32.mxu1 %v2914_v24  ;;  %3637 = vmatpush3.msra.mxu1 %v2960_v10  ;;  %v3302_v24 = vld [vmem:[%s5695_s9 + $0x8] sm:$0xff] }
 0x2ef   :  { %3638 = vmatprep.subr.mxu1 %v2975_v43  ;;  %3804 = vmatpush3.msra.mxu0 %v3306_v16  ;;  %v3303_v43 = vld [vmem:[%s5695_s9 + $0x10] sm:$0xff] }
 0x2f0   :  { %3639 = vmatpush3.msra.mxu1 %v2959_v29  ;;  %3805 = vmatprep.subr.mxu0 %v5722_v56  ;;  %v3301_v29 = vld [vmem:[%s5695_s9] sm:$0xff]  ;;  %s3396_s9 = sshll.u32 %s3863_s4, 4  ;;  %s3397_s9 = int_to_ptr.vmem [resolvable:$true] %s3396_s9 }
 0x2f1   :  { %3640 = vmatprep.subr.mxu1 %v2974_v40  ;;  %3806 = vmatpush3.msra.mxu0 %v3305_v6  ;;  %v3459_v40 = vld [vmem:[%s5694_s8] ss:$0 sm:$0xff]  ;;  %s3836_s23 = scalar_lea.vmem %s3397_s9, 32  ;;  %p3841_p1 = scmp.lt.s32.totalorder %s3397_s9, %s3397_s9 }
 0x2f2   :  { %3641 = vmatpush3.msra.mxu1 %v2958_v33  ;;  %3807 = vmatprep.subr.mxu0 %v5722_v56  ;;  %p3837_p0 = scmp.ne.s32.totalorder %s3397_s9, %s3836_s23  ;;  %p3842_p2 = scmp.lt.s32.totalorder %s3836_s23, %s3836_s23 }
 0x2f3   :  { %3642 = vmatprep.subr.mxu1 %v2973_v4  ;;  %3808 = vmatpush3.msra.mxu0 %v3304_v15 }
 0x2f4   :  { %3643 = vmatpush3.msra.mxu1 %v2957_v12  ;;  %3809 = vmatprep.subr.mxu0 %v5722_v56  ;;  %p3843_p3 = por %p3842_p2, %p3841_p1 }
 0x2f5   :  { %3644 = vmatprep.subr.mxu1 %v2972_v52  ;;  %3810 = vmatpush3.msra.mxu0 %v3303_v43 }
 0x2f6   :  { %3645 = vmatpush3.msra.mxu1 %v2956_v42  ;;  %3811 = vmatprep.subr.mxu0 %v5722_v56  ;;  %v3460_v42 = vld [vmem:[%s5696_s10] ss:$0 sm:$0xff]  ;;  %p3844_p4 = pnand %p3843_p3, %p3837_p0 }
 0x2f7   :  { %3646 = vmatprep.subr.mxu1 %v2971_v49  ;;  %3812 = vmatpush3.msra.mxu0 %v3302_v24 }
 0x2f8   :  { %3647 = vmatpush3.msra.mxu1 %v2955_v21  ;;  %3813 = vmatprep.subr.mxu0 %v5722_v56 }
 0x2f9   :  { %3648 = vmatprep.subr.mxu1 %v2970_v11  ;;  %3814 = vmatpush3.msra.mxu0 %v3301_v29 }
 0x2fa   :  { %3649 = vmatpush3.msra.mxu1 %v2954_v2 }
 0x2fb   :  { %3650 = vmatprep.subr.mxu1 %v2969_v60 }
 0x2fc   :  { %3651 = vmatpush3.msra.mxu1 %v2953_v0 }
 0x2fd   :  { %3652 = vmatprep.subr.mxu1 %v2968_v37 }
 0x2fe   :  { %3653 = vmatpush3.msra.mxu1 %v2952_v7 }
 0x2ff   :  { %3654 = vmatprep.subr.mxu1 %v2967_v1 }
 0x300   :  { %3655 = vmatpush3.msra.mxu1 %v2951_v8 }
 0x301   :  { %3656 = vmatprep.subr.mxu1 %v2966_v39 }
 0x302   :  { %3657 = vmatpush3.msra.mxu1 %v2950_v41 }
 0x303   :  { %3658 = vmatprep.subr.mxu1 %v2965_v22 }
 0x304   :  { %3659 = vmatpush3.msra.mxu1 %v2949_v3 }
 0x305   :  { %3660 = vmatprep.subr.mxu1 %v2964_v61 }
 0x306   :  { %3661 = vmatpush3.msra.mxu1 %v2948_v58 }
 0x307   :  { %3662 = vmatprep.subr.mxu1 %v2963_v36 }
 0x308   :  { %3663 = vmatpush3.msra.mxu1 %v2947_v20 }
 0x309   :  { %3131 = vmatmul.mubr.f32.vlgmr.msra.gmra.mxu1 %v2913_v50  ;;  %3764 = vmatprep.subr.mxu1 %v5722_v56 }
 0x30a   :  { %3796 = vmatprep.mubr.msk.f32.mxu1 %vm3862_vm3, %v5722_v56  ;;  %3765 = vmatpush3.msra.mxu1 %v3222_v54 }
 0x30b   :  { %3766 = vmatprep.subr.mxu1 %v5722_v56 }
 0x30c   :  { %3767 = vmatpush3.msra.mxu1 %v3221_v26 }
 0x30d   :  { %3768 = vmatprep.subr.mxu1 %v5722_v56 }
 0x30e   :  { %3769 = vmatpush3.msra.mxu1 %v3220_v55 }
 0x30f   :  { %3770 = vmatprep.subr.mxu1 %v5722_v56 }
 0x310   :  { %3771 = vmatpush3.msra.mxu1 %v3219_v9 }
 0x311   :  { %3772 = vmatprep.subr.mxu1 %v5722_v56 }
 0x312   :  { %3773 = vmatpush3.msra.mxu1 %v3218_v62 }
 0x313   :  { %3774 = vmatprep.subr.mxu1 %v5722_v56 }
 0x314   :  { %3775 = vmatpush3.msra.mxu1 %v3217_v25 }
 0x315   :  { %3776 = vmatprep.subr.mxu1 %v5722_v56 }
 0x316   :  { %3777 = vmatpush3.msra.mxu1 %v3216_v59 }
 0x317   :  { %3778 = vmatprep.subr.mxu1 %v5722_v56 }
 0x318   :  { %3779 = vmatpush3.msra.mxu1 %v3215_v30 }
 0x319   :  { %3780 = vmatprep.subr.mxu1 %v5722_v56 }
 0x31a   :  { %3781 = vmatpush3.msra.mxu1 %v3214_v44 }
 0x31b   :  { %3782 = vmatprep.subr.mxu1 %v5722_v56 }
 0x31c   :  { %3783 = vmatpush3.msra.mxu1 %v3213_v28 }
 0x31d   :  { %3784 = vmatprep.subr.mxu1 %v5722_v56 }
 0x31e   :  { %3785 = vmatpush3.msra.mxu1 %v3212_v19 }
 0x31f   :  { %3786 = vmatprep.subr.mxu1 %v5722_v56 }
 0x320   :  { %3787 = vmatpush3.msra.mxu1 %v3211_v46 }
 0x321   :  { %3788 = vmatprep.subr.mxu1 %v5722_v56 }
 0x322   :  { %3789 = vmatpush3.msra.mxu1 %v3210_v47 }
 0x323   :  { %3790 = vmatprep.subr.mxu1 %v5722_v56 }
 0x324   :  { %3791 = vmatpush3.msra.mxu1 %v3209_v13 }
 0x325   :  { %3792 = vmatprep.subr.mxu1 %v5722_v56 }
 0x326   :  { %3793 = vmatpush3.msra.mxu1 %v3208_v17 }
 0x327   :  { %3794 = vmatprep.subr.mxu1 %v5722_v56 }
 0x328   :  { %3795 = vmatpush3.msra.mxu1 %v3207_v63 }
 0x338   :  { %v3202_v45 = vpop.f32.mrf.mxu0 }
 0x33a   :  { %v3763_v34 = vpop.f32.mrf.mxu0 }
 0x3a9   :  { %v3629_v48 = vpop.f32.mrf.mxu1 }
 0x3ab   :  { %v3630_v27 = vpop.f32.mrf.mxu1 }
 0x3ac   :  { %v3631_v18 = vadd.f32 %v3630_v27, %v3629_v48 }
 0x3ae   :  { %v3063_v51 = vadd.f32 %v3631_v18, %v3457_v14 }
 0x3c9   :  { %v3664_v23 = vpop.f32.mrf.mxu1 }
 0x3cb   :  { %v3665_v38 = vpop.f32.mrf.mxu1 }
 0x3cc   :  { %v3666_v35 = vadd.f32 %v3665_v38, %v3664_v23 }
 0x3ce   :  { %v3133_v57 = vadd.f32 %v3666_v35, %v3063_v51 }
 0x3d0   :  { %v3203_v53 = vadd.f32 %v3202_v45, %v3133_v57 }
 0x3d2   :  { %v3206_v10 = vmax.f32 %v3203_v53, 0.0 }
 0x3d4   :  { %3797 = vmatmul.mubr.f32.vlgmr.msra.gmra.mxu1 %v3206_v10 }
 0x494   :  { %v3296_v33 = vpop.f32.mrf.mxu1 }
 0x495   :  { %v3297_v4 = vadd.f32 %v3459_v40, %v3296_v33 }
 0x496   :  { %v3798_v12 = vpop.f32.mrf.mxu1 }
 0x497   :  { %v3300_v52 = vmax.f32 %v3297_v4, 0.0 }
 0x499   :  { %3816 = vmatmul.mubr.msk.f32.vlgmr.msra.gmra.mxu0 %vm877_vm2, %v3300_v52 }
 0x559   :  { %v3385_v49 = vpop.f32.mrf.mxu0 }
 0x55a   :  { %v3386_v21 = vadd.f32 %v3460_v42, %v3385_v49 }
 0x55b   :  { %v3817_v56 = vpop.f32.mrf.mxu0 }
 0x55c   :  { %3389 = vst [vmem:[#allocation2] sm:$0x3] %v3386_v21 }
 0x55d   :  { %3847 = shalt.err (!%p3844_p4)
}
 0x55e   :  { %3399 = dma.vmem_to_hbm [thread:$0]  %s3397_s9, 32, %s5697_s11, [#allocation3]  }
 0x55f   :  { %3856 = dma.done.wait [#allocation3], 32  }
 0x560   :  { %3857 = vsyncadd [#allocation3], 4294967264 }
 0x561   :  { %3403 = vsyncpa [#allocation3], 1 }

</bundles_post_ra>
